<compile_context>
chip_gen: v5e
topology: v5e:2x2
jax: 0.10.0
libtpu: 0.0.40
codegen_flags: <defaults>
</compile_context>

<pallas_src>
import math

import numpy as np
import jax
import jax.numpy as jnp
from jax import lax
from jax.experimental import pallas as pl
from jax.experimental.pallas import tpu as pltpu  # noqa: F401

# ---------------- model hyper-params (small, consistent with the module) ----
BATCH      = 2
SEQ_TGT    = 8
SEQ_MEM    = 8
D_MODEL    = 32
NUM_HEADS  = 4
HEAD_DIM   = D_MODEL // NUM_HEADS
D_FF       = 64
NUM_LAYERS = 2
LN_EPS     = 1e-5
NEG_INF    = -1e30

R   = BATCH * SEQ_TGT          # folded tgt rows     (16)
RKV = BATCH * SEQ_MEM          # folded memory rows  (16)
HR  = NUM_HEADS * RKV          # heads-along-lanes score width (64)

assert SEQ_TGT == SEQ_MEM      # one head-mask stack / blkdiag serves both attns

# -------- packed parameter slab layout (rows of a (SLAB_ROWS, 128) array) ----
# All row offsets are multiples of 8 and every sub-block starts at lane 0, so
# in-kernel static slices are free views.
ROW_W_QKV_S    = 0      # (32, 96)  fused self-attn Q|K|V (scale folded into Q)
ROW_W_KV_C     = 32     # (32, 64)  fused cross-attn K|V
ROW_W_Q_C      = 64     # (32, 32)  cross-attn Q (scale folded)
ROW_W_O_S      = 96     # (32, 32)  self-attn output proj
ROW_W_O_C      = 128    # (32, 32)  cross-attn output proj
ROW_W_FF1      = 160    # (32, 64)
ROW_W_FF2      = 192    # (64, 32)
ROW_BIAS       = 256    # (16, 128) bias / LayerNorm block (rows below)
ROW_HMASK      = 272    # (64, 32)  head-lane mask stack
ROW_BIAS_SELF  = 336    # (16, 64)  tiled causal + batch-block score bias
ROW_BIAS_CROSS = 352    # (16, 64)  tiled batch-block score bias
ROW_BLKDIAG    = 368    # (64, 64)  per-head block-diagonal ones
SLAB_ROWS      = 432


# ------------------------- compile-time constants ----------------------------
def _block_bias(q_len, kv_len, causal):
    """Additive score bias on the folded (B*q_len, B*kv_len) score matrix:
    only same-batch blocks are allowed (+ causal within the block)."""
    r = np.arange(BATCH * q_len)[:, None]
    c = np.arange(BATCH * kv_len)[None, :]
    ok = (r // q_len) == (c // kv_len)
    if causal:
        ok = ok & ((c % kv_len) <= (r % q_len))
    return np.where(ok, 0.0, NEG_INF).astype(np.float32)


def _head_mask_stack():
    """(H*RKV, D): block h keeps only head h's HEAD_DIM feature lanes."""
    m = np.zeros((HR, D_MODEL), np.float32)
    for h in range(NUM_HEADS):
        m[h * RKV:(h + 1) * RKV, h * HEAD_DIM:(h + 1) * HEAD_DIM] = 1.0
    return m


def _block_diag_ones():
    """(H*RKV, H*RKV) block-diagonal ones: p @ this recovers per-head softmax
    denominators broadcast back onto each head's column block."""
    i = np.arange(HR)
    return (i[:, None] // RKV == i[None, :] // RKV).astype(np.float32)


# ------------------------------- kernel -------------------------------------
def decoder_kernel(x_ref, mem_ref, w_ref, out_ref):
    x   = x_ref[...]              # (R,   D) folded (batch*seq, d_model)
    mem = mem_ref[...]            # (RKV, D)

    # Only the tiny bias/LayerNorm block is hoisted (2 vregs); every weight
    # matrix and attention constant is read at its point of use so regalloc
    # can rematerialize from VMEM instead of spilling.
    bias = w_ref[ROW_BIAS:ROW_BIAS + 16, :]              # (16, 128)
    b_qkv_s = bias[0:1, 0:3 * D_MODEL]
    b_kv_c  = bias[1:2, 0:2 * D_MODEL]
    b_ff1   = bias[2:3, 0:D_FF]
    b_q_c   = bias[3:4, 0:D_MODEL]
    b_o_s   = bias[4:5, 0:D_MODEL]
    b_o_c   = bias[5:6, 0:D_MODEL]
    b_ff2   = bias[6:7, 0:D_MODEL]
    g1, be1 = bias[7:8,  0:D_MODEL], bias[8:9,   0:D_MODEL]
    g2, be2 = bias[9:10, 0:D_MODEL], bias[10:11, 0:D_MODEL]
    g3, be3 = bias[11:12, 0:D_MODEL], bias[12:13, 0:D_MODEL]

    def layer_norm(v, g, b):
        mu  = jnp.mean(v, axis=-1, keepdims=True)
        var = jnp.mean((v - mu) ** 2, axis=-1, keepdims=True)
        return (v - mu) / jnp.sqrt(var + LN_EPS) * g + b

    def stack_heads(a):
        # (RKV, D) -> (H*RKV, D): sublane-aligned stack (RKV=16 is a multiple
        # of 8, so the concat is free vreg placement) masked so block h keeps
        # only head h's lanes.  (q*m_h)·k == q·(k*m_h).
        hmask = w_ref[ROW_HMASK:ROW_HMASK + HR, 0:D_MODEL]
        return jnp.concatenate([a] * NUM_HEADS, axis=0) * hmask

    def attention(q, k_stack, v_stack, bias_row):
        # q: (R, D) (scale already folded into its projection),
        # k_stack / v_stack: (H*RKV, D) head-lane-masked.
        score_bias = w_ref[bias_row:bias_row + R, 0:HR]              # (R, HR)
        blkdiag    = w_ref[ROW_BLKDIAG:ROW_BLKDIAG + HR, 0:HR]       # (HR, HR)
        s = lax.dot_general(q, k_stack, (((1,), (1,)), ((), ())),
                            preferred_element_type=jnp.float32) + score_bias
        # one per-row max over all heads is valid by softmax shift-invariance
        # (per-head denominators are recovered below); every row has at least
        # one unmasked entry (causal diagonal / same-batch block).
        s = s - jnp.max(s, axis=-1, keepdims=True)
        p = jnp.exp(s)
        denom = jnp.dot(p, blkdiag, preferred_element_type=jnp.float32)
        p = p / denom                                   # exact divide
        # head-masked V writes each head's output into its own lanes; the
        # matmul's sum over head blocks reproduces the concat layout directly.
        return jnp.dot(p, v_stack, preferred_element_type=jnp.float32)

    # Cross-attention K/V (and their head stacks) depend only on `memory` and
    # the shared weights -> layer-invariant: compute once.
    kv_c = (jnp.dot(mem, w_ref[ROW_W_KV_C:ROW_W_KV_C + D_MODEL, 0:2 * D_MODEL],
                    preferred_element_type=jnp.float32) + b_kv_c)
    k_c_stack = stack_heads(kv_c[:, 0:D_MODEL])
    v_c_stack = stack_heads(kv_c[:, D_MODEL:2 * D_MODEL])

    # ---- post-norm decoder layers (identical weights, static unroll) -------
    for _ in range(NUM_LAYERS):
        # self-attention (fused QKV projection: one matmul, MXU has slack)
        qkv = (jnp.dot(x, w_ref[ROW_W_QKV_S:ROW_W_QKV_S + D_MODEL, 0:3 * D_MODEL],
                       preferred_element_type=jnp.float32) + b_qkv_s)
        q       = qkv[:, 0:D_MODEL]
        k_stack = stack_heads(qkv[:, D_MODEL:2 * D_MODEL])
        v_stack = stack_heads(qkv[:, 2 * D_MODEL:3 * D_MODEL])
        sa = attention(q, k_stack, v_stack, ROW_BIAS_SELF)
        sa = (jnp.dot(sa, w_ref[ROW_W_O_S:ROW_W_O_S + D_MODEL, 0:D_MODEL],
                      preferred_element_type=jnp.float32) + b_o_s)
        x = layer_norm(x + sa, g1, be1)

        # cross-attention (K/V stacks hoisted above the layer loop)
        q_c = (jnp.dot(x, w_ref[ROW_W_Q_C:ROW_W_Q_C + D_MODEL, 0:D_MODEL],
                       preferred_element_type=jnp.float32) + b_q_c)
        ca = attention(q_c, k_c_stack, v_c_stack, ROW_BIAS_CROSS)
        ca = (jnp.dot(ca, w_ref[ROW_W_O_C:ROW_W_O_C + D_MODEL, 0:D_MODEL],
                      preferred_element_type=jnp.float32) + b_o_c)
        x = layer_norm(x + ca, g2, be2)

        # feed-forward
        h = jnp.maximum(
            jnp.dot(x, w_ref[ROW_W_FF1:ROW_W_FF1 + D_MODEL, 0:D_FF],
                    preferred_element_type=jnp.float32) + b_ff1, 0.0)
        ff = (jnp.dot(h, w_ref[ROW_W_FF2:ROW_W_FF2 + D_FF, 0:D_MODEL],
                      preferred_element_type=jnp.float32) + b_ff2)
        x = layer_norm(x + ff, g3, be3)

    out_ref[...] = x
    # NOTE(v7x): footprint < 256 KiB, single invocation on one TensorCore is
    # the right call at this size (launch/latency bound); add a parallel batch
    # grid axis only if shapes grow enough to amortize ~0.35 us per grid step.


# ------------------------------ wrapper --------------------------------------
@jax.jit
def transformer_decoder_pallas(tgt, memory, slab):
    B, S, D = tgt.shape
    M = memory.shape[1]
    # Fold batch into the row (sublane) dimension (pure layout plumbing).
    x2   = tgt.reshape(B * S, D)
    mem2 = memory.reshape(B * M, D)
    # Single invocation, no grid: 3 input DMAs (x, memory, packed slab), all
    # resident in VMEM via the default full-array BlockSpecs.
    out = pl.pallas_call(
        decoder_kernel,
        out_shape=jax.ShapeDtypeStruct((B * S, D), jnp.float32),
    )(x2, mem2, slab)
    return out.reshape(B, S, D)


# --------------------------- parameter packing --------------------------------
def pack_params(p):
    """Pack the 26 raw parameter arrays + attention constants into ONE
    128-lane-dense (SLAB_ROWS, 128) f32 slab."""
    (wq_s, bq_s, wk_s, bk_s, wv_s, bv_s, wo_s, bo_s,
     wq_c, bq_c, wk_c, bk_c, wv_c, bv_c, wo_c, bo_c,
     w1, b1, w2, b2, g1, be1, g2, be2, g3, be3) = [
        np.asarray(a, np.float32) for a in p]

    scale = 1.0 / math.sqrt(HEAD_DIM)
    wq_s = wq_s * scale; bq_s = bq_s * scale   # fold softmax scale into Q proj
    wq_c = wq_c * scale; bq_c = bq_c * scale

    slab = np.zeros((SLAB_ROWS, 128), np.float32)

    def put(r0, a):
        slab[r0:r0 + a.shape[0], 0:a.shape[1]] = a

    put(ROW_W_QKV_S, np.concatenate([wq_s, wk_s, wv_s], axis=1))   # (32, 96)
    put(ROW_W_KV_C,  np.concatenate([wk_c, wv_c], axis=1))         # (32, 64)
    put(ROW_W_Q_C,   wq_c)
    put(ROW_W_O_S,   wo_s)
    put(ROW_W_O_C,   wo_c)
    put(ROW_W_FF1,   w1)
    put(ROW_W_FF2,   w2)

    put(ROW_BIAS + 0,  np.concatenate([bq_s, bk_s, bv_s], axis=1))  # (1, 96)
    put(ROW_BIAS + 1,  np.concatenate([bk_c, bv_c], axis=1))        # (1, 64)
    put(ROW_BIAS + 2,  b1)
    put(ROW_BIAS + 3,  bq_c)
    put(ROW_BIAS + 4,  bo_s)
    put(ROW_BIAS + 5,  bo_c)
    put(ROW_BIAS + 6,  b2)
    put(ROW_BIAS + 7,  g1);  put(ROW_BIAS + 8,  be1)
    put(ROW_BIAS + 9,  g2);  put(ROW_BIAS + 10, be2)
    put(ROW_BIAS + 11, g3);  put(ROW_BIAS + 12, be3)

    # compile-time attention constants
    put(ROW_HMASK,      _head_mask_stack())
    put(ROW_BIAS_SELF,
        np.tile(_block_bias(SEQ_TGT, SEQ_TGT, causal=True), (1, NUM_HEADS)))
    put(ROW_BIAS_CROSS,
        np.tile(_block_bias(SEQ_TGT, SEQ_MEM, causal=False), (1, NUM_HEADS)))
    put(ROW_BLKDIAG,    _block_diag_ones())

    return jnp.asarray(slab)


# --------------------------- pure-JAX reference -------------------------------
def _ref_layer(x, mem, p):
    (wq_s, bq_s, wk_s, bk_s, wv_s, bv_s, wo_s, bo_s,
     wq_c, bq_c, wk_c, bk_c, wv_c, bv_c, wo_c, bo_c,
     w1, b1, w2, b2, g1, be1, g2, be2, g3, be3) = p

    def ln(v, g, b):
        mu = jnp.mean(v, -1, keepdims=True)
        var = jnp.mean((v - mu) ** 2, -1, keepdims=True)
        return (v - mu) / jnp.sqrt(var + LN_EPS) * g + b

    def mha(q_in, kv_in, wq, bq, wk, bk, wv, bv, wo, bo, causal):
        B, S, D = q_in.shape
        M = kv_in.shape[1]
        q = (q_in @ wq + bq).reshape(B, S, NUM_HEADS, HEAD_DIM)
        k = (kv_in @ wk + bk).reshape(B, M, NUM_HEADS, HEAD_DIM)
        v = (kv_in @ wv + bv).reshape(B, M, NUM_HEADS, HEAD_DIM)
        s = jnp.einsum("bshd,bmhd->bhsm", q, k) / math.sqrt(HEAD_DIM)
        if causal:
            mask = jnp.tril(jnp.ones((S, M), bool))
            s = jnp.where(mask[None, None], s, NEG_INF)
        p_ = jax.nn.softmax(s, axis=-1)
        o = jnp.einsum("bhsm,bmhd->bshd", p_, v).reshape(B, S, D)
        return o @ wo + bo

    x = ln(x + mha(x, x, wq_s, bq_s, wk_s, bk_s, wv_s, bv_s, wo_s, bo_s, True),
           g1[0], be1[0])
    x = ln(x + mha(x, mem, wq_c, bq_c, wk_c, bk_c, wv_c, bv_c, wo_c, bo_c,
                   False), g2[0], be2[0])
    ff = jnp.maximum(x @ w1 + b1[0], 0.0) @ w2 + b2[0]
    return ln(x + ff, g3[0], be3[0])


def transformer_decoder_ref(tgt, memory, params, num_layers=NUM_LAYERS):
    out = tgt
    for _ in range(num_layers):
        out = _ref_layer(out, memory, params)
    return out


# ---------------------------- parameter init ----------------------------------
def init_params(key):
    ks = jax.random.split(key, 32)
    i = iter(range(32))

    def xavier(k, shape):
        fan_in, fan_out = shape[0], shape[1]
        lim = math.sqrt(6.0 / (fan_in + fan_out))
        return jax.random.uniform(k, shape, jnp.float32, -lim, lim)

    def proj():
        return [xavier(ks[next(i)], (D_MODEL, D_MODEL)),
                jnp.zeros((1, D_MODEL), jnp.float32)]

    params = []
    for _ in range(4):            # self-attn: Wq,bq,Wk,bk,Wv,bv,Wo,bo
        params += proj()
    for _ in range(4):            # cross-attn
        params += proj()
    params += [xavier(ks[next(i)], (D_MODEL, D_FF)),
               jnp.zeros((1, D_FF), jnp.float32),
               xavier(ks[next(i)], (D_FF, D_MODEL)),
               jnp.zeros((1, D_MODEL), jnp.float32)]
    for _ in range(3):            # layer norms: gamma, beta
        params += [jnp.ones((1, D_MODEL), jnp.float32),
                   jnp.zeros((1, D_MODEL), jnp.float32)]
    return tuple(params)


# --------------------------------- main ---------------------------------------
if __name__ == "__main__":
    key = jax.random.PRNGKey(0)
    k_tgt, k_mem, k_par = jax.random.split(key, 3)

    tgt    = jax.random.normal(k_tgt, (BATCH, SEQ_TGT, D_MODEL), jnp.float32)
    memory = jax.random.normal(k_mem, (BATCH, SEQ_MEM, D_MODEL), jnp.float32)
    raw    = init_params(k_par)
    slab   = pack_params(raw)

    out = transformer_decoder_pallas(tgt, memory, slab)
    out = jax.block_until_ready(out)

    with jax.default_matmul_precision("highest"):
        ref = transformer_decoder_ref(tgt, memory, raw)
    ref = jax.block_until_ready(ref)

    assert out.shape == (BATCH, SEQ_TGT, D_MODEL)
    err = float(jnp.max(jnp.abs(out - ref)))
    assert err < 2e-3, f"max abs err = {err}"

    print("KERNEL_OK")
</pallas_src>

<mosaic_0001>
module attributes {stable_mosaic.version = 11 : i64} {
  func.func @decoder_kernel(%arg0: memref<16x32xf32, #tpu.memory_space<vmem>>, %arg1: memref<16x32xf32, #tpu.memory_space<vmem>>, %arg2: memref<432x128xf32, #tpu.memory_space<vmem>>, %arg3: memref<16x32xf32, #tpu.memory_space<vmem>>) attributes {dimension_semantics = [], scalar_prefetch = 0 : i64, scratch_operands = 0 : i64, tpu.core_type = #tpu.core_type<tc>} {
    %c0 = arith.constant 0 : index
    %c0_0 = arith.constant 0 : index
    %0 = vector.load %arg0[%c0, %c0_0] : memref<16x32xf32, #tpu.memory_space<vmem>>, vector<16x32xf32>
    %c0_1 = arith.constant 0 : index
    %c0_2 = arith.constant 0 : index
    %1 = vector.load %arg1[%c0_1, %c0_2] : memref<16x32xf32, #tpu.memory_space<vmem>>, vector<16x32xf32>
    %c256 = arith.constant 256 : index
    %c0_3 = arith.constant 0 : index
    %2 = vector.load %arg2[%c256, %c0_3] : memref<432x128xf32, #tpu.memory_space<vmem>>, vector<16x128xf32>
    %3 = vector.extract_strided_slice %2 {offsets = [0, 0], sizes = [1, 96], strides = [1, 1]} : vector<16x128xf32> to vector<1x96xf32>
    %4 = vector.extract_strided_slice %2 {offsets = [1, 0], sizes = [1, 64], strides = [1, 1]} : vector<16x128xf32> to vector<1x64xf32>
    %5 = vector.extract_strided_slice %2 {offsets = [2, 0], sizes = [1, 64], strides = [1, 1]} : vector<16x128xf32> to vector<1x64xf32>
    %6 = vector.extract_strided_slice %2 {offsets = [3, 0], sizes = [1, 32], strides = [1, 1]} : vector<16x128xf32> to vector<1x32xf32>
    %7 = vector.extract_strided_slice %2 {offsets = [4, 0], sizes = [1, 32], strides = [1, 1]} : vector<16x128xf32> to vector<1x32xf32>
    %8 = vector.extract_strided_slice %2 {offsets = [5, 0], sizes = [1, 32], strides = [1, 1]} : vector<16x128xf32> to vector<1x32xf32>
    %9 = vector.extract_strided_slice %2 {offsets = [6, 0], sizes = [1, 32], strides = [1, 1]} : vector<16x128xf32> to vector<1x32xf32>
    %10 = vector.extract_strided_slice %2 {offsets = [7, 0], sizes = [1, 32], strides = [1, 1]} : vector<16x128xf32> to vector<1x32xf32>
    %11 = vector.extract_strided_slice %2 {offsets = [8, 0], sizes = [1, 32], strides = [1, 1]} : vector<16x128xf32> to vector<1x32xf32>
    %12 = vector.extract_strided_slice %2 {offsets = [9, 0], sizes = [1, 32], strides = [1, 1]} : vector<16x128xf32> to vector<1x32xf32>
    %13 = vector.extract_strided_slice %2 {offsets = [10, 0], sizes = [1, 32], strides = [1, 1]} : vector<16x128xf32> to vector<1x32xf32>
    %14 = vector.extract_strided_slice %2 {offsets = [11, 0], sizes = [1, 32], strides = [1, 1]} : vector<16x128xf32> to vector<1x32xf32>
    %15 = vector.extract_strided_slice %2 {offsets = [12, 0], sizes = [1, 32], strides = [1, 1]} : vector<16x128xf32> to vector<1x32xf32>
    %c32 = arith.constant 32 : index
    %c0_4 = arith.constant 0 : index
    %16 = vector.load %arg2[%c32, %c0_4] : memref<432x128xf32, #tpu.memory_space<vmem>>, vector<32x64xf32>
    %cst = arith.constant dense<0.000000e+00> : vector<16x64xf32>
    %17 = tpu.matmul %1, %16, %cst {dimension_numbers = #tpu.dot_dimension_numbers<[1], [0], [0], [1], [0, 0, 1, 1], [], []>} : vector<16x32xf32>, vector<32x64xf32>, vector<16x64xf32> -> vector<16x64xf32>
    %18 = vector.broadcast %4 : vector<1x64xf32> to vector<16x64xf32>
    %19 = arith.addf %17, %18 : vector<16x64xf32>
    %20 = vector.extract_strided_slice %19 {offsets = [0, 0], sizes = [16, 32], strides = [1, 1]} : vector<16x64xf32> to vector<16x32xf32>
    %c272 = arith.constant 272 : index
    %c0_5 = arith.constant 0 : index
    %21 = vector.load %arg2[%c272, %c0_5] : memref<432x128xf32, #tpu.memory_space<vmem>>, vector<64x32xf32>
    %22 = tpu.concatenate %20, %20, %20, %20 in 0 : vector<16x32xf32>, vector<16x32xf32>, vector<16x32xf32>, vector<16x32xf32> -> vector<64x32xf32>
    %23 = arith.mulf %22, %21 : vector<64x32xf32>
    %24 = vector.extract_strided_slice %19 {offsets = [0, 32], sizes = [16, 32], strides = [1, 1]} : vector<16x64xf32> to vector<16x32xf32>
    %c272_6 = arith.constant 272 : index
    %c0_7 = arith.constant 0 : index
    %25 = vector.load %arg2[%c272_6, %c0_7] : memref<432x128xf32, #tpu.memory_space<vmem>>, vector<64x32xf32>
    %26 = tpu.concatenate %24, %24, %24, %24 in 0 : vector<16x32xf32>, vector<16x32xf32>, vector<16x32xf32>, vector<16x32xf32> -> vector<64x32xf32>
    %27 = arith.mulf %26, %25 : vector<64x32xf32>
    %c0_8 = arith.constant 0 : index
    %c0_9 = arith.constant 0 : index
    %28 = vector.load %arg2[%c0_8, %c0_9] : memref<432x128xf32, #tpu.memory_space<vmem>>, vector<32x96xf32>
    %cst_10 = arith.constant dense<0.000000e+00> : vector<16x96xf32>
    %29 = tpu.matmul %0, %28, %cst_10 {dimension_numbers = #tpu.dot_dimension_numbers<[1], [0], [0], [1], [0, 0, 1, 1], [], []>} : vector<16x32xf32>, vector<32x96xf32>, vector<16x96xf32> -> vector<16x96xf32>
    %30 = vector.broadcast %3 : vector<1x96xf32> to vector<16x96xf32>
    %31 = arith.addf %29, %30 : vector<16x96xf32>
    %32 = vector.extract_strided_slice %31 {offsets = [0, 0], sizes = [16, 32], strides = [1, 1]} : vector<16x96xf32> to vector<16x32xf32>
    %33 = vector.extract_strided_slice %31 {offsets = [0, 32], sizes = [16, 32], strides = [1, 1]} : vector<16x96xf32> to vector<16x32xf32>
    %c272_11 = arith.constant 272 : index
    %c0_12 = arith.constant 0 : index
    %34 = vector.load %arg2[%c272_11, %c0_12] : memref<432x128xf32, #tpu.memory_space<vmem>>, vector<64x32xf32>
    %35 = tpu.concatenate %33, %33, %33, %33 in 0 : vector<16x32xf32>, vector<16x32xf32>, vector<16x32xf32>, vector<16x32xf32> -> vector<64x32xf32>
    %36 = arith.mulf %35, %34 : vector<64x32xf32>
    %37 = vector.extract_strided_slice %31 {offsets = [0, 64], sizes = [16, 32], strides = [1, 1]} : vector<16x96xf32> to vector<16x32xf32>
    %c272_13 = arith.constant 272 : index
    %c0_14 = arith.constant 0 : index
    %38 = vector.load %arg2[%c272_13, %c0_14] : memref<432x128xf32, #tpu.memory_space<vmem>>, vector<64x32xf32>
    %39 = tpu.concatenate %37, %37, %37, %37 in 0 : vector<16x32xf32>, vector<16x32xf32>, vector<16x32xf32>, vector<16x32xf32> -> vector<64x32xf32>
    %40 = arith.mulf %39, %38 : vector<64x32xf32>
    %c336 = arith.constant 336 : index
    %c0_15 = arith.constant 0 : index
    %41 = vector.load %arg2[%c336, %c0_15] : memref<432x128xf32, #tpu.memory_space<vmem>>, vector<16x64xf32>
    %c368 = arith.constant 368 : index
    %c0_16 = arith.constant 0 : index
    %42 = vector.load %arg2[%c368, %c0_16] : memref<432x128xf32, #tpu.memory_space<vmem>>, vector<64x64xf32>
    %cst_17 = arith.constant dense<0.000000e+00> : vector<16x64xf32>
    %43 = tpu.matmul %32, %36, %cst_17 {dimension_numbers = #tpu.dot_dimension_numbers<[1], [1], [0], [0], [0, 0, 1, 0], [], []>} : vector<16x32xf32>, vector<64x32xf32>, vector<16x64xf32> -> vector<16x64xf32>
    %44 = arith.addf %43, %41 : vector<16x64xf32>
    %cst_18 = arith.constant dense<0xFF800000> : vector<16xf32>
    %45 = vector.multi_reduction <maximumf>, %44, %cst_18 [1] : vector<16x64xf32> to vector<16xf32>
    %46 = vector.shape_cast %45 : vector<16xf32> to vector<16x1xf32>
    %47 = vector.broadcast %46 : vector<16x1xf32> to vector<16x64xf32>
    %48 = arith.subf %44, %47 : vector<16x64xf32>
    %49 = math.exp %48 : vector<16x64xf32>
    %cst_19 = arith.constant dense<0.000000e+00> : vector<16x64xf32>
    %50 = tpu.matmul %49, %42, %cst_19 {dimension_numbers = #tpu.dot_dimension_numbers<[1], [0], [0], [1], [0, 0, 1, 1], [], []>} : vector<16x64xf32>, vector<64x64xf32>, vector<16x64xf32> -> vector<16x64xf32>
    %51 = arith.divf %49, %50 : vector<16x64xf32>
    %cst_20 = arith.constant dense<0.000000e+00> : vector<16x32xf32>
    %52 = tpu.matmul %51, %40, %cst_20 {dimension_numbers = #tpu.dot_dimension_numbers<[1], [0], [0], [1], [0, 0, 1, 1], [], []>} : vector<16x64xf32>, vector<64x32xf32>, vector<16x32xf32> -> vector<16x32xf32>
    %c96 = arith.constant 96 : index
    %c0_21 = arith.constant 0 : index
    %53 = vector.load %arg2[%c96, %c0_21] : memref<432x128xf32, #tpu.memory_space<vmem>>, vector<32x32xf32>
    %cst_22 = arith.constant dense<0.000000e+00> : vector<16x32xf32>
    %54 = tpu.matmul %52, %53, %cst_22 {dimension_numbers = #tpu.dot_dimension_numbers<[1], [0], [0], [1], [0, 0, 1, 1], [], []>} : vector<16x32xf32>, vector<32x32xf32>, vector<16x32xf32> -> vector<16x32xf32>
    %55 = vector.broadcast %7 : vector<1x32xf32> to vector<16x32xf32>
    %56 = arith.addf %54, %55 : vector<16x32xf32>
    %57 = arith.addf %0, %56 : vector<16x32xf32>
    %cst_23 = arith.constant dense<0.000000e+00> : vector<16xf32>
    %58 = vector.multi_reduction <add>, %57, %cst_23 [1] : vector<16x32xf32> to vector<16xf32>
    %59 = vector.shape_cast %58 : vector<16xf32> to vector<16x1xf32>
    %cst_24 = arith.constant 3.200000e+01 : f32
    %60 = vector.broadcast %cst_24 : f32 to vector<16x1xf32>
    %61 = arith.divf %59, %60 : vector<16x1xf32>
    %62 = vector.broadcast %61 : vector<16x1xf32> to vector<16x32xf32>
    %63 = arith.subf %57, %62 : vector<16x32xf32>
    %64 = arith.mulf %63, %63 : vector<16x32xf32>
    %cst_25 = arith.constant dense<0.000000e+00> : vector<16xf32>
    %65 = vector.multi_reduction <add>, %64, %cst_25 [1] : vector<16x32xf32> to vector<16xf32>
    %66 = vector.shape_cast %65 : vector<16xf32> to vector<16x1xf32>
    %cst_26 = arith.constant 3.200000e+01 : f32
    %67 = vector.broadcast %cst_26 : f32 to vector<16x1xf32>
    %68 = arith.divf %66, %67 : vector<16x1xf32>
    %69 = vector.broadcast %61 : vector<16x1xf32> to vector<16x32xf32>
    %70 = arith.subf %57, %69 : vector<16x32xf32>
    %cst_27 = arith.constant 9.99999974E-6 : f32
    %71 = vector.broadcast %cst_27 : f32 to vector<16x1xf32>
    %72 = arith.addf %68, %71 : vector<16x1xf32>
    %73 = math.sqrt %72 : vector<16x1xf32>
    %74 = vector.broadcast %73 : vector<16x1xf32> to vector<16x32xf32>
    %75 = arith.divf %70, %74 : vector<16x32xf32>
    %76 = vector.broadcast %10 : vector<1x32xf32> to vector<16x32xf32>
    %77 = arith.mulf %75, %76 : vector<16x32xf32>
    %78 = vector.broadcast %11 : vector<1x32xf32> to vector<16x32xf32>
    %79 = arith.addf %77, %78 : vector<16x32xf32>
    %c64 = arith.constant 64 : index
    %c0_28 = arith.constant 0 : index
    %80 = vector.load %arg2[%c64, %c0_28] : memref<432x128xf32, #tpu.memory_space<vmem>>, vector<32x32xf32>
    %cst_29 = arith.constant dense<0.000000e+00> : vector<16x32xf32>
    %81 = tpu.matmul %79, %80, %cst_29 {dimension_numbers = #tpu.dot_dimension_numbers<[1], [0], [0], [1], [0, 0, 1, 1], [], []>} : vector<16x32xf32>, vector<32x32xf32>, vector<16x32xf32> -> vector<16x32xf32>
    %82 = vector.broadcast %6 : vector<1x32xf32> to vector<16x32xf32>
    %83 = arith.addf %81, %82 : vector<16x32xf32>
    %c352 = arith.constant 352 : index
    %c0_30 = arith.constant 0 : index
    %84 = vector.load %arg2[%c352, %c0_30] : memref<432x128xf32, #tpu.memory_space<vmem>>, vector<16x64xf32>
    %c368_31 = arith.constant 368 : index
    %c0_32 = arith.constant 0 : index
    %85 = vector.load %arg2[%c368_31, %c0_32] : memref<432x128xf32, #tpu.memory_space<vmem>>, vector<64x64xf32>
    %cst_33 = arith.constant dense<0.000000e+00> : vector<16x64xf32>
    %86 = tpu.matmul %83, %23, %cst_33 {dimension_numbers = #tpu.dot_dimension_numbers<[1], [1], [0], [0], [0, 0, 1, 0], [], []>} : vector<16x32xf32>, vector<64x32xf32>, vector<16x64xf32> -> vector<16x64xf32>
    %87 = arith.addf %86, %84 : vector<16x64xf32>
    %cst_34 = arith.constant dense<0xFF800000> : vector<16xf32>
    %88 = vector.multi_reduction <maximumf>, %87, %cst_34 [1] : vector<16x64xf32> to vector<16xf32>
    %89 = vector.shape_cast %88 : vector<16xf32> to vector<16x1xf32>
    %90 = vector.broadcast %89 : vector<16x1xf32> to vector<16x64xf32>
    %91 = arith.subf %87, %90 : vector<16x64xf32>
    %92 = math.exp %91 : vector<16x64xf32>
    %cst_35 = arith.constant dense<0.000000e+00> : vector<16x64xf32>
    %93 = tpu.matmul %92, %85, %cst_35 {dimension_numbers = #tpu.dot_dimension_numbers<[1], [0], [0], [1], [0, 0, 1, 1], [], []>} : vector<16x64xf32>, vector<64x64xf32>, vector<16x64xf32> -> vector<16x64xf32>
    %94 = arith.divf %92, %93 : vector<16x64xf32>
    %cst_36 = arith.constant dense<0.000000e+00> : vector<16x32xf32>
    %95 = tpu.matmul %94, %27, %cst_36 {dimension_numbers = #tpu.dot_dimension_numbers<[1], [0], [0], [1], [0, 0, 1, 1], [], []>} : vector<16x64xf32>, vector<64x32xf32>, vector<16x32xf32> -> vector<16x32xf32>
    %c128 = arith.constant 128 : index
    %c0_37 = arith.constant 0 : index
    %96 = vector.load %arg2[%c128, %c0_37] : memref<432x128xf32, #tpu.memory_space<vmem>>, vector<32x32xf32>
    %cst_38 = arith.constant dense<0.000000e+00> : vector<16x32xf32>
    %97 = tpu.matmul %95, %96, %cst_38 {dimension_numbers = #tpu.dot_dimension_numbers<[1], [0], [0], [1], [0, 0, 1, 1], [], []>} : vector<16x32xf32>, vector<32x32xf32>, vector<16x32xf32> -> vector<16x32xf32>
    %98 = vector.broadcast %8 : vector<1x32xf32> to vector<16x32xf32>
    %99 = arith.addf %97, %98 : vector<16x32xf32>
    %100 = arith.addf %79, %99 : vector<16x32xf32>
    %cst_39 = arith.constant dense<0.000000e+00> : vector<16xf32>
    %101 = vector.multi_reduction <add>, %100, %cst_39 [1] : vector<16x32xf32> to vector<16xf32>
    %102 = vector.shape_cast %101 : vector<16xf32> to vector<16x1xf32>
    %cst_40 = arith.constant 3.200000e+01 : f32
    %103 = vector.broadcast %cst_40 : f32 to vector<16x1xf32>
    %104 = arith.divf %102, %103 : vector<16x1xf32>
    %105 = vector.broadcast %104 : vector<16x1xf32> to vector<16x32xf32>
    %106 = arith.subf %100, %105 : vector<16x32xf32>
    %107 = arith.mulf %106, %106 : vector<16x32xf32>
    %cst_41 = arith.constant dense<0.000000e+00> : vector<16xf32>
    %108 = vector.multi_reduction <add>, %107, %cst_41 [1] : vector<16x32xf32> to vector<16xf32>
    %109 = vector.shape_cast %108 : vector<16xf32> to vector<16x1xf32>
    %cst_42 = arith.constant 3.200000e+01 : f32
    %110 = vector.broadcast %cst_42 : f32 to vector<16x1xf32>
    %111 = arith.divf %109, %110 : vector<16x1xf32>
    %112 = vector.broadcast %104 : vector<16x1xf32> to vector<16x32xf32>
    %113 = arith.subf %100, %112 : vector<16x32xf32>
    %cst_43 = arith.constant 9.99999974E-6 : f32
    %114 = vector.broadcast %cst_43 : f32 to vector<16x1xf32>
    %115 = arith.addf %111, %114 : vector<16x1xf32>
    %116 = math.sqrt %115 : vector<16x1xf32>
    %117 = vector.broadcast %116 : vector<16x1xf32> to vector<16x32xf32>
    %118 = arith.divf %113, %117 : vector<16x32xf32>
    %119 = vector.broadcast %12 : vector<1x32xf32> to vector<16x32xf32>
    %120 = arith.mulf %118, %119 : vector<16x32xf32>
    %121 = vector.broadcast %13 : vector<1x32xf32> to vector<16x32xf32>
    %122 = arith.addf %120, %121 : vector<16x32xf32>
    %c160 = arith.constant 160 : index
    %c0_44 = arith.constant 0 : index
    %123 = vector.load %arg2[%c160, %c0_44] : memref<432x128xf32, #tpu.memory_space<vmem>>, vector<32x64xf32>
    %cst_45 = arith.constant dense<0.000000e+00> : vector<16x64xf32>
    %124 = tpu.matmul %122, %123, %cst_45 {dimension_numbers = #tpu.dot_dimension_numbers<[1], [0], [0], [1], [0, 0, 1, 1], [], []>} : vector<16x32xf32>, vector<32x64xf32>, vector<16x64xf32> -> vector<16x64xf32>
    %125 = vector.broadcast %5 : vector<1x64xf32> to vector<16x64xf32>
    %126 = arith.addf %124, %125 : vector<16x64xf32>
    %cst_46 = arith.constant 0.000000e+00 : f32
    %127 = vector.broadcast %cst_46 : f32 to vector<16x64xf32>
    %128 = arith.maximumf %126, %127 : vector<16x64xf32>
    %c192 = arith.constant 192 : index
    %c0_47 = arith.constant 0 : index
    %129 = vector.load %arg2[%c192, %c0_47] : memref<432x128xf32, #tpu.memory_space<vmem>>, vector<64x32xf32>
    %cst_48 = arith.constant dense<0.000000e+00> : vector<16x32xf32>
    %130 = tpu.matmul %128, %129, %cst_48 {dimension_numbers = #tpu.dot_dimension_numbers<[1], [0], [0], [1], [0, 0, 1, 1], [], []>} : vector<16x64xf32>, vector<64x32xf32>, vector<16x32xf32> -> vector<16x32xf32>
    %131 = vector.broadcast %9 : vector<1x32xf32> to vector<16x32xf32>
    %132 = arith.addf %130, %131 : vector<16x32xf32>
    %133 = arith.addf %122, %132 : vector<16x32xf32>
    %cst_49 = arith.constant dense<0.000000e+00> : vector<16xf32>
    %134 = vector.multi_reduction <add>, %133, %cst_49 [1] : vector<16x32xf32> to vector<16xf32>
    %135 = vector.shape_cast %134 : vector<16xf32> to vector<16x1xf32>
    %cst_50 = arith.constant 3.200000e+01 : f32
    %136 = vector.broadcast %cst_50 : f32 to vector<16x1xf32>
    %137 = arith.divf %135, %136 : vector<16x1xf32>
    %138 = vector.broadcast %137 : vector<16x1xf32> to vector<16x32xf32>
    %139 = arith.subf %133, %138 : vector<16x32xf32>
    %140 = arith.mulf %139, %139 : vector<16x32xf32>
    %cst_51 = arith.constant dense<0.000000e+00> : vector<16xf32>
    %141 = vector.multi_reduction <add>, %140, %cst_51 [1] : vector<16x32xf32> to vector<16xf32>
    %142 = vector.shape_cast %141 : vector<16xf32> to vector<16x1xf32>
    %cst_52 = arith.constant 3.200000e+01 : f32
    %143 = vector.broadcast %cst_52 : f32 to vector<16x1xf32>
    %144 = arith.divf %142, %143 : vector<16x1xf32>
    %145 = vector.broadcast %137 : vector<16x1xf32> to vector<16x32xf32>
    %146 = arith.subf %133, %145 : vector<16x32xf32>
    %cst_53 = arith.constant 9.99999974E-6 : f32
    %147 = vector.broadcast %cst_53 : f32 to vector<16x1xf32>
    %148 = arith.addf %144, %147 : vector<16x1xf32>
    %149 = math.sqrt %148 : vector<16x1xf32>
    %150 = vector.broadcast %149 : vector<16x1xf32> to vector<16x32xf32>
    %151 = arith.divf %146, %150 : vector<16x32xf32>
    %152 = vector.broadcast %14 : vector<1x32xf32> to vector<16x32xf32>
    %153 = arith.mulf %151, %152 : vector<16x32xf32>
    %154 = vector.broadcast %15 : vector<1x32xf32> to vector<16x32xf32>
    %155 = arith.addf %153, %154 : vector<16x32xf32>
    %c0_54 = arith.constant 0 : index
    %c0_55 = arith.constant 0 : index
    %156 = vector.load %arg2[%c0_54, %c0_55] : memref<432x128xf32, #tpu.memory_space<vmem>>, vector<32x96xf32>
    %cst_56 = arith.constant dense<0.000000e+00> : vector<16x96xf32>
    %157 = tpu.matmul %155, %156, %cst_56 {dimension_numbers = #tpu.dot_dimension_numbers<[1], [0], [0], [1], [0, 0, 1, 1], [], []>} : vector<16x32xf32>, vector<32x96xf32>, vector<16x96xf32> -> vector<16x96xf32>
    %158 = vector.broadcast %3 : vector<1x96xf32> to vector<16x96xf32>
    %159 = arith.addf %157, %158 : vector<16x96xf32>
    %160 = vector.extract_strided_slice %159 {offsets = [0, 0], sizes = [16, 32], strides = [1, 1]} : vector<16x96xf32> to vector<16x32xf32>
    %161 = vector.extract_strided_slice %159 {offsets = [0, 32], sizes = [16, 32], strides = [1, 1]} : vector<16x96xf32> to vector<16x32xf32>
    %c272_57 = arith.constant 272 : index
    %c0_58 = arith.constant 0 : index
    %162 = vector.load %arg2[%c272_57, %c0_58] : memref<432x128xf32, #tpu.memory_space<vmem>>, vector<64x32xf32>
    %163 = tpu.concatenate %161, %161, %161, %161 in 0 : vector<16x32xf32>, vector<16x32xf32>, vector<16x32xf32>, vector<16x32xf32> -> vector<64x32xf32>
    %164 = arith.mulf %163, %162 : vector<64x32xf32>
    %165 = vector.extract_strided_slice %159 {offsets = [0, 64], sizes = [16, 32], strides = [1, 1]} : vector<16x96xf32> to vector<16x32xf32>
    %c272_59 = arith.constant 272 : index
    %c0_60 = arith.constant 0 : index
    %166 = vector.load %arg2[%c272_59, %c0_60] : memref<432x128xf32, #tpu.memory_space<vmem>>, vector<64x32xf32>
    %167 = tpu.concatenate %165, %165, %165, %165 in 0 : vector<16x32xf32>, vector<16x32xf32>, vector<16x32xf32>, vector<16x32xf32> -> vector<64x32xf32>
    %168 = arith.mulf %167, %166 : vector<64x32xf32>
    %c336_61 = arith.constant 336 : index
    %c0_62 = arith.constant 0 : index
    %169 = vector.load %arg2[%c336_61, %c0_62] : memref<432x128xf32, #tpu.memory_space<vmem>>, vector<16x64xf32>
    %c368_63 = arith.constant 368 : index
    %c0_64 = arith.constant 0 : index
    %170 = vector.load %arg2[%c368_63, %c0_64] : memref<432x128xf32, #tpu.memory_space<vmem>>, vector<64x64xf32>
    %cst_65 = arith.constant dense<0.000000e+00> : vector<16x64xf32>
    %171 = tpu.matmul %160, %164, %cst_65 {dimension_numbers = #tpu.dot_dimension_numbers<[1], [1], [0], [0], [0, 0, 1, 0], [], []>} : vector<16x32xf32>, vector<64x32xf32>, vector<16x64xf32> -> vector<16x64xf32>
    %172 = arith.addf %171, %169 : vector<16x64xf32>
    %cst_66 = arith.constant dense<0xFF800000> : vector<16xf32>
    %173 = vector.multi_reduction <maximumf>, %172, %cst_66 [1] : vector<16x64xf32> to vector<16xf32>
    %174 = vector.shape_cast %173 : vector<16xf32> to vector<16x1xf32>
    %175 = vector.broadcast %174 : vector<16x1xf32> to vector<16x64xf32>
    %176 = arith.subf %172, %175 : vector<16x64xf32>
    %177 = math.exp %176 : vector<16x64xf32>
    %cst_67 = arith.constant dense<0.000000e+00> : vector<16x64xf32>
    %178 = tpu.matmul %177, %170, %cst_67 {dimension_numbers = #tpu.dot_dimension_numbers<[1], [0], [0], [1], [0, 0, 1, 1], [], []>} : vector<16x64xf32>, vector<64x64xf32>, vector<16x64xf32> -> vector<16x64xf32>
    %179 = arith.divf %177, %178 : vector<16x64xf32>
    %cst_68 = arith.constant dense<0.000000e+00> : vector<16x32xf32>
    %180 = tpu.matmul %179, %168, %cst_68 {dimension_numbers = #tpu.dot_dimension_numbers<[1], [0], [0], [1], [0, 0, 1, 1], [], []>} : vector<16x64xf32>, vector<64x32xf32>, vector<16x32xf32> -> vector<16x32xf32>
    %c96_69 = arith.constant 96 : index
    %c0_70 = arith.constant 0 : index
    %181 = vector.load %arg2[%c96_69, %c0_70] : memref<432x128xf32, #tpu.memory_space<vmem>>, vector<32x32xf32>
    %cst_71 = arith.constant dense<0.000000e+00> : vector<16x32xf32>
    %182 = tpu.matmul %180, %181, %cst_71 {dimension_numbers = #tpu.dot_dimension_numbers<[1], [0], [0], [1], [0, 0, 1, 1], [], []>} : vector<16x32xf32>, vector<32x32xf32>, vector<16x32xf32> -> vector<16x32xf32>
    %183 = vector.broadcast %7 : vector<1x32xf32> to vector<16x32xf32>
    %184 = arith.addf %182, %183 : vector<16x32xf32>
    %185 = arith.addf %155, %184 : vector<16x32xf32>
    %cst_72 = arith.constant dense<0.000000e+00> : vector<16xf32>
    %186 = vector.multi_reduction <add>, %185, %cst_72 [1] : vector<16x32xf32> to vector<16xf32>
    %187 = vector.shape_cast %186 : vector<16xf32> to vector<16x1xf32>
    %cst_73 = arith.constant 3.200000e+01 : f32
    %188 = vector.broadcast %cst_73 : f32 to vector<16x1xf32>
    %189 = arith.divf %187, %188 : vector<16x1xf32>
    %190 = vector.broadcast %189 : vector<16x1xf32> to vector<16x32xf32>
    %191 = arith.subf %185, %190 : vector<16x32xf32>
    %192 = arith.mulf %191, %191 : vector<16x32xf32>
    %cst_74 = arith.constant dense<0.000000e+00> : vector<16xf32>
    %193 = vector.multi_reduction <add>, %192, %cst_74 [1] : vector<16x32xf32> to vector<16xf32>
    %194 = vector.shape_cast %193 : vector<16xf32> to vector<16x1xf32>
    %cst_75 = arith.constant 3.200000e+01 : f32
    %195 = vector.broadcast %cst_75 : f32 to vector<16x1xf32>
    %196 = arith.divf %194, %195 : vector<16x1xf32>
    %197 = vector.broadcast %189 : vector<16x1xf32> to vector<16x32xf32>
    %198 = arith.subf %185, %197 : vector<16x32xf32>
    %cst_76 = arith.constant 9.99999974E-6 : f32
    %199 = vector.broadcast %cst_76 : f32 to vector<16x1xf32>
    %200 = arith.addf %196, %199 : vector<16x1xf32>
    %201 = math.sqrt %200 : vector<16x1xf32>
    %202 = vector.broadcast %201 : vector<16x1xf32> to vector<16x32xf32>
    %203 = arith.divf %198, %202 : vector<16x32xf32>
    %204 = vector.broadcast %10 : vector<1x32xf32> to vector<16x32xf32>
    %205 = arith.mulf %203, %204 : vector<16x32xf32>
    %206 = vector.broadcast %11 : vector<1x32xf32> to vector<16x32xf32>
    %207 = arith.addf %205, %206 : vector<16x32xf32>
    %c64_77 = arith.constant 64 : index
    %c0_78 = arith.constant 0 : index
    %208 = vector.load %arg2[%c64_77, %c0_78] : memref<432x128xf32, #tpu.memory_space<vmem>>, vector<32x32xf32>
    %cst_79 = arith.constant dense<0.000000e+00> : vector<16x32xf32>
    %209 = tpu.matmul %207, %208, %cst_79 {dimension_numbers = #tpu.dot_dimension_numbers<[1], [0], [0], [1], [0, 0, 1, 1], [], []>} : vector<16x32xf32>, vector<32x32xf32>, vector<16x32xf32> -> vector<16x32xf32>
    %210 = vector.broadcast %6 : vector<1x32xf32> to vector<16x32xf32>
    %211 = arith.addf %209, %210 : vector<16x32xf32>
    %c352_80 = arith.constant 352 : index
    %c0_81 = arith.constant 0 : index
    %212 = vector.load %arg2[%c352_80, %c0_81] : memref<432x128xf32, #tpu.memory_space<vmem>>, vector<16x64xf32>
    %c368_82 = arith.constant 368 : index
    %c0_83 = arith.constant 0 : index
    %213 = vector.load %arg2[%c368_82, %c0_83] : memref<432x128xf32, #tpu.memory_space<vmem>>, vector<64x64xf32>
    %cst_84 = arith.constant dense<0.000000e+00> : vector<16x64xf32>
    %214 = tpu.matmul %211, %23, %cst_84 {dimension_numbers = #tpu.dot_dimension_numbers<[1], [1], [0], [0], [0, 0, 1, 0], [], []>} : vector<16x32xf32>, vector<64x32xf32>, vector<16x64xf32> -> vector<16x64xf32>
    %215 = arith.addf %214, %212 : vector<16x64xf32>
    %cst_85 = arith.constant dense<0xFF800000> : vector<16xf32>
    %216 = vector.multi_reduction <maximumf>, %215, %cst_85 [1] : vector<16x64xf32> to vector<16xf32>
    %217 = vector.shape_cast %216 : vector<16xf32> to vector<16x1xf32>
    %218 = vector.broadcast %217 : vector<16x1xf32> to vector<16x64xf32>
    %219 = arith.subf %215, %218 : vector<16x64xf32>
    %220 = math.exp %219 : vector<16x64xf32>
    %cst_86 = arith.constant dense<0.000000e+00> : vector<16x64xf32>
    %221 = tpu.matmul %220, %213, %cst_86 {dimension_numbers = #tpu.dot_dimension_numbers<[1], [0], [0], [1], [0, 0, 1, 1], [], []>} : vector<16x64xf32>, vector<64x64xf32>, vector<16x64xf32> -> vector<16x64xf32>
    %222 = arith.divf %220, %221 : vector<16x64xf32>
    %cst_87 = arith.constant dense<0.000000e+00> : vector<16x32xf32>
    %223 = tpu.matmul %222, %27, %cst_87 {dimension_numbers = #tpu.dot_dimension_numbers<[1], [0], [0], [1], [0, 0, 1, 1], [], []>} : vector<16x64xf32>, vector<64x32xf32>, vector<16x32xf32> -> vector<16x32xf32>
    %c128_88 = arith.constant 128 : index
    %c0_89 = arith.constant 0 : index
    %224 = vector.load %arg2[%c128_88, %c0_89] : memref<432x128xf32, #tpu.memory_space<vmem>>, vector<32x32xf32>
    %cst_90 = arith.constant dense<0.000000e+00> : vector<16x32xf32>
    %225 = tpu.matmul %223, %224, %cst_90 {dimension_numbers = #tpu.dot_dimension_numbers<[1], [0], [0], [1], [0, 0, 1, 1], [], []>} : vector<16x32xf32>, vector<32x32xf32>, vector<16x32xf32> -> vector<16x32xf32>
    %226 = vector.broadcast %8 : vector<1x32xf32> to vector<16x32xf32>
    %227 = arith.addf %225, %226 : vector<16x32xf32>
    %228 = arith.addf %207, %227 : vector<16x32xf32>
    %cst_91 = arith.constant dense<0.000000e+00> : vector<16xf32>
    %229 = vector.multi_reduction <add>, %228, %cst_91 [1] : vector<16x32xf32> to vector<16xf32>
    %230 = vector.shape_cast %229 : vector<16xf32> to vector<16x1xf32>
    %cst_92 = arith.constant 3.200000e+01 : f32
    %231 = vector.broadcast %cst_92 : f32 to vector<16x1xf32>
    %232 = arith.divf %230, %231 : vector<16x1xf32>
    %233 = vector.broadcast %232 : vector<16x1xf32> to vector<16x32xf32>
    %234 = arith.subf %228, %233 : vector<16x32xf32>
    %235 = arith.mulf %234, %234 : vector<16x32xf32>
    %cst_93 = arith.constant dense<0.000000e+00> : vector<16xf32>
    %236 = vector.multi_reduction <add>, %235, %cst_93 [1] : vector<16x32xf32> to vector<16xf32>
    %237 = vector.shape_cast %236 : vector<16xf32> to vector<16x1xf32>
    %cst_94 = arith.constant 3.200000e+01 : f32
    %238 = vector.broadcast %cst_94 : f32 to vector<16x1xf32>
    %239 = arith.divf %237, %238 : vector<16x1xf32>
    %240 = vector.broadcast %232 : vector<16x1xf32> to vector<16x32xf32>
    %241 = arith.subf %228, %240 : vector<16x32xf32>
    %cst_95 = arith.constant 9.99999974E-6 : f32
    %242 = vector.broadcast %cst_95 : f32 to vector<16x1xf32>
    %243 = arith.addf %239, %242 : vector<16x1xf32>
    %244 = math.sqrt %243 : vector<16x1xf32>
    %245 = vector.broadcast %244 : vector<16x1xf32> to vector<16x32xf32>
    %246 = arith.divf %241, %245 : vector<16x32xf32>
    %247 = vector.broadcast %12 : vector<1x32xf32> to vector<16x32xf32>
    %248 = arith.mulf %246, %247 : vector<16x32xf32>
    %249 = vector.broadcast %13 : vector<1x32xf32> to vector<16x32xf32>
    %250 = arith.addf %248, %249 : vector<16x32xf32>
    %c160_96 = arith.constant 160 : index
    %c0_97 = arith.constant 0 : index
    %251 = vector.load %arg2[%c160_96, %c0_97] : memref<432x128xf32, #tpu.memory_space<vmem>>, vector<32x64xf32>
    %cst_98 = arith.constant dense<0.000000e+00> : vector<16x64xf32>
    %252 = tpu.matmul %250, %251, %cst_98 {dimension_numbers = #tpu.dot_dimension_numbers<[1], [0], [0], [1], [0, 0, 1, 1], [], []>} : vector<16x32xf32>, vector<32x64xf32>, vector<16x64xf32> -> vector<16x64xf32>
    %253 = vector.broadcast %5 : vector<1x64xf32> to vector<16x64xf32>
    %254 = arith.addf %252, %253 : vector<16x64xf32>
    %cst_99 = arith.constant 0.000000e+00 : f32
    %255 = vector.broadcast %cst_99 : f32 to vector<16x64xf32>
    %256 = arith.maximumf %254, %255 : vector<16x64xf32>
    %c192_100 = arith.constant 192 : index
    %c0_101 = arith.constant 0 : index
    %257 = vector.load %arg2[%c192_100, %c0_101] : memref<432x128xf32, #tpu.memory_space<vmem>>, vector<64x32xf32>
    %cst_102 = arith.constant dense<0.000000e+00> : vector<16x32xf32>
    %258 = tpu.matmul %256, %257, %cst_102 {dimension_numbers = #tpu.dot_dimension_numbers<[1], [0], [0], [1], [0, 0, 1, 1], [], []>} : vector<16x64xf32>, vector<64x32xf32>, vector<16x32xf32> -> vector<16x32xf32>
    %259 = vector.broadcast %9 : vector<1x32xf32> to vector<16x32xf32>
    %260 = arith.addf %258, %259 : vector<16x32xf32>
    %261 = arith.addf %250, %260 : vector<16x32xf32>
    %cst_103 = arith.constant dense<0.000000e+00> : vector<16xf32>
    %262 = vector.multi_reduction <add>, %261, %cst_103 [1] : vector<16x32xf32> to vector<16xf32>
    %263 = vector.shape_cast %262 : vector<16xf32> to vector<16x1xf32>
    %cst_104 = arith.constant 3.200000e+01 : f32
    %264 = vector.broadcast %cst_104 : f32 to vector<16x1xf32>
    %265 = arith.divf %263, %264 : vector<16x1xf32>
    %266 = vector.broadcast %265 : vector<16x1xf32> to vector<16x32xf32>
    %267 = arith.subf %261, %266 : vector<16x32xf32>
    %268 = arith.mulf %267, %267 : vector<16x32xf32>
    %cst_105 = arith.constant dense<0.000000e+00> : vector<16xf32>
    %269 = vector.multi_reduction <add>, %268, %cst_105 [1] : vector<16x32xf32> to vector<16xf32>
    %270 = vector.shape_cast %269 : vector<16xf32> to vector<16x1xf32>
    %cst_106 = arith.constant 3.200000e+01 : f32
    %271 = vector.broadcast %cst_106 : f32 to vector<16x1xf32>
    %272 = arith.divf %270, %271 : vector<16x1xf32>
    %273 = vector.broadcast %265 : vector<16x1xf32> to vector<16x32xf32>
    %274 = arith.subf %261, %273 : vector<16x32xf32>
    %cst_107 = arith.constant 9.99999974E-6 : f32
    %275 = vector.broadcast %cst_107 : f32 to vector<16x1xf32>
    %276 = arith.addf %272, %275 : vector<16x1xf32>
    %277 = math.sqrt %276 : vector<16x1xf32>
    %278 = vector.broadcast %277 : vector<16x1xf32> to vector<16x32xf32>
    %279 = arith.divf %274, %278 : vector<16x32xf32>
    %280 = vector.broadcast %14 : vector<1x32xf32> to vector<16x32xf32>
    %281 = arith.mulf %279, %280 : vector<16x32xf32>
    %282 = vector.broadcast %15 : vector<1x32xf32> to vector<16x32xf32>
    %283 = arith.addf %281, %282 : vector<16x32xf32>
    %c0_108 = arith.constant 0 : index
    %c0_109 = arith.constant 0 : index
    %284 = vector.load %arg3[%c0_108, %c0_109] : memref<16x32xf32, #tpu.memory_space<vmem>>, vector<16x32xf32>
    tpu.vector_store %arg3[%c0_108, %c0_109], %283 {strides = array<i32>} : memref<16x32xf32, #tpu.memory_space<vmem>>, vector<16x32xf32>,
    return
  }
}

</mosaic_0001>

<bundles_post_ra>
// kernel: transformer_decoder_pallas.1
= control target key start
LH: loop header
LB: loop body
LE: loop exit
PB: predicated region body
PF: predicated region fallthrough
CT: control target
= control target key end

     0   :  { %8 = vsyncpa [#allocation3], 0  ;;  %s3037_s0 = inlined_call_operand.hbm [shape: f32[16,32], index: 0, kind: input, shape index: {}]   ;;  %s3038_s1 = inlined_call_operand.hbm [shape: f32[16,32], index: 1, kind: input, shape index: {}]   ;;  %s3039_s2 = inlined_call_operand.hbm [shape: f32[432,128], index: 2, kind: input, shape index: {}]   ;;  %s3040_s3 = inlined_call_operand.hbm [shape: f32[16,32], index: 3, kind: output, shape index: {}]  }
   0x1   :  { %9 = vsyncpa [#allocation6], 0 }
   0x2   :  { %10 = vsyncpa [#allocation4], 0  ;;  %s28_s14 = sshll.u32 %s3038_s1, 4  ;;  %s2214_s15 = smov [#allocation5]   ;;  %s29_s14 = int_to_ptr.hbm [resolvable:$true] %s28_s14 }
   0x3   :  { %s30_s16 = sshll.u32 %s2214_s15, 4  ;;  %s15_s19 = sshll.u32 %s3037_s0, 4  ;;  %s31_s16 = int_to_ptr.vmem [resolvable:$true] %s30_s16  ;;  %s16_s19 = int_to_ptr.hbm [resolvable:$true] %s15_s19 }
   0x4   :  { %s2215_s20 = smov 128   ;;  %s2216_s21 = smov 8  }
   0x5   :  { %36 = dma.hbm_to_vmem [thread:$0]  %s29_s14, 256, %s31_s16, [#allocation6], %s2215_s20, %s2215_s20, %s2216_s21  }
   0x6   :  { %s2217_s22 = smov [#allocation2]   ;;  %s41_s1 = sshll.u32 %s3039_s2, 4  ;;  %s42_s1 = int_to_ptr.hbm [resolvable:$true] %s41_s1 }
   0x7   :  { %s17_s23 = sshll.u32 %s2217_s22, 4  ;;  %s2218_s0 = smov [#allocation7]   ;;  %s18_s23 = int_to_ptr.vmem [resolvable:$true] %s17_s23 }
   0x8   :  { %23 = dma.hbm_to_vmem [thread:$0]  %s16_s19, 256, %s18_s23, [#allocation3], %s2215_s20, %s2215_s20, %s2216_s21  }
   0x9   :  { %s43_s26 = sshll.u32 %s2218_s0, 4  ;;  %s44_s26 = int_to_ptr.vmem [resolvable:$true] %s43_s26 }
   0xa   :  { %49 = dma.hbm_to_vmem [thread:$0]  %s42_s1, 6912, %s44_s26, [#allocation6], %s2215_s20, %s2215_s20, %s2216_s21  }
   0xb   :  { %2208 = dma.done.wait [#allocation3], 256  }
   0xc   :  { %2209 = vsyncadd [#allocation3], 4294967040 }
   0xd   :  { %2210 = dma.done.wait [#allocation6], 7168  }
   0xe   :  { %2211 = vsyncadd [#allocation6], 4294960128  ;;  %v71_v0 = vld [vmem:[#allocation7 + $0x38] sm:$0xff]  ;;  %v70_v2 = vld [vmem:[#allocation7 + $0x30] sm:$0xff]  ;;  %s2219_s2 = smov 32   ;;  %vm73_vm0 = vcmask 261120  }
   0xf   :  { %v2262_v1 = vld [vmem:[#allocation7 + $0x18] sm:$0xff]  ;;  %92 = vmatpush.msra.mxu0 %v71_v0  ;;  %v2265_v3 = vld [vmem:[#allocation7 + $0x10] sm:$0xff]  ;;  %v2269_v5 = vld [vmem:[#allocation7 + $0x8] sm:$0xff]  ;;  %s2220_s27 = smov 96   ;;  %s2221_s28 = smov 64   ;;  %vm312_vm1 = vcmask 523264  }
  0x10   :  { %182 = vmatpush.msra.mxu1 %v2262_v1  ;;  %v2267_v4 = vld [vmem:[#allocation7 + $0x138] sm:$0xff]  ;;  %v69_v6 = vld [vmem:[#allocation7 + $0x28] sm:$0xff]  ;;  %v68_v8 = vld [vmem:[#allocation7 + $0x20] sm:$0xff]  ;;  %s2223_s29 = smov [#allocation8]   ;;  %s1843_s6 = sshll.u32 %s3040_s3, 4  ;;  %s1844_s6 = int_to_ptr.hbm [resolvable:$true] %s1843_s6 }
  0x11   :  { %137 = vrot.lane.b32.xlu1 %v2267_v4, %s2219_s2  ;;  %93 = vmatpush.msra.mxu0 %v70_v2  ;;  %v2274_v7 = vld [vmem:[#allocation7 + $0x148] sm:$0xff]  ;;  %v2276_v9 = vld [vmem:[#allocation7] sm:$0xff]  ;;  %v64_v10 = vld [vmem:[#allocation5] sm:$0xff]  ;;  %s1841_s30 = sshll.u32 %s2223_s29, 4  ;;  %s1842_s30 = int_to_ptr.vmem [resolvable:$true] %s1841_s30 }
  0x12   :  { %183 = vmatpush.msra.mxu1 %v2265_v3  ;;  %141 = vrot.lane.b32.xlu0 %v2274_v7, %s2219_s2  ;;  %v2281_v11 = vld [vmem:[#allocation2] sm:$0xff]  ;;  %v2283_v12 = vld [vmem:[#allocation7 + $0x128] sm:$0xff]  ;;  %v2286_v13 = vld [vmem:[#allocation7 + $0x130] sm:$0xff] }
  0x13   :  { %94 = vmatpush.msra.mxu0 %v69_v6  ;;  %v2291_v14 = vld [vmem:[#allocation7 + $0x140] sm:$0xff]  ;;  %133 = vrot.lane.b32.xlu2 %v2283_v12, %s2219_s2  ;;  %v65_v15 = vld [vmem:[#allocation5 + $0x8] sm:$0xff]  ;;  %v2299_v16 = vld [vmem:[#allocation2 + $0x8] sm:$0xff] }
  0x14   :  { %184 = vmatpush.msra.mxu1 %v2269_v5  ;;  %v2301_v17 = vld [vmem:[#allocation7 + $0x120] sm:$0xff]  ;;  %v2303_v18 = vld [vmem:[#allocation7 + $0x110] sm:$0xff]  ;;  %v2308_v19 = vld [vmem:[#allocation7 + $0x118] sm:$0xff] }
  0x15   :  { %95 = vmatpush.msra.mxu0 %v68_v8  ;;  %v2318_v21 = vld [vmem:[#allocation7 + $0x100] sm:$0xff]  ;;  %v233_v2 = vld [vmem:[#allocation7 + $0x150] sm:$0xff] }
  0x16   :  { %185 = vmatpush.msra.mxu1 %v2276_v9  ;;  %1857 = vmatmul.msk.f32.vlgmr.msra.gmra.mxu0 %vm73_vm0, %v64_v10  ;;  %v2323_v23 = vperm.slane %v2318_v21, 0 }
  0x17   :  { %1859 = vmatmul.msk.f32.vlgmr.msra.gmra.mxu1 %vm73_vm0, %v2281_v11 }
  0x19   :  { %135 = vrot.lane.b32.xlu1 %v2286_v13, %s2219_s2 }
  0x1a   :  { %139 = vrot.lane.b32.xlu0 %v2291_v14, %s2219_s2 }
  0x1b   :  { %131 = vrot.lane.b32.xlu2 %v2301_v17, %s2219_s2 }
  0x1e   :  { %1858 = vmatmul.msk.f32.gmra.mxu0 %vm73_vm0, %v65_v15  ;;  %v2414_v15 = vld [vmem:[#allocation7 + $0x1a8] sm:$0xff] }
  0x1f   :  { %1860 = vmatmul.msk.f32.gmra.mxu1 %vm73_vm0, %v2299_v16  ;;  %339 = vmatpush.msra.mxu3 %v2414_v15 }
  0x21   :  { %127 = vrot.lane.b32.xlu1 %v2303_v18, %s2219_s2 }
  0x22   :  { %129 = vrot.lane.b32.xlu0 %v2308_v19, %s2219_s2 }
  0x6d   :  { %v2333_v28 = vpop.permute.xlu2 %133 }
  0x75   :  { %v2349_v35 = vpop.permute.xlu2 %131 }
  0x83   :  { %v2320_v22 = vpop.permute.xlu1 %137 }
  0x84   :  { %v2316_v20 = vpop.permute.xlu0 %141 }
  0x8b   :  { %v2335_v29 = vpop.permute.xlu1 %135 }
  0x8c   :  { %v2325_v25 = vpop.permute.xlu0 %139 }
  0x93   :  { %v2351_v36 = vpop.permute.xlu1 %127 }
  0x94   :  { %v187_v24 = vpop.f32.mrf.mxu1  ;;  %v2362_v40 = vpop.permute.xlu0 %129 }
  0x95   :  { %v2328_v26 = vadd.f32 %v187_v24, %v2323_v23  ;;  %v2416_v24 = vld [vmem:[#allocation7 + $0x1a0] sm:$0xff] }
  0x96   :  { %340 = vmatpush.msra.mxu3 %v2416_v24 }
  0x97   :  { %v199_v27 = vmul.f32 %v2328_v26, %v2325_v25  ;;  %v195_v37 = vmul.f32 %v2328_v26, %v2349_v35  ;;  %v197_v38 = vmul.f32 %v2328_v26, %v2335_v29  ;;  %v193_v39 = vmul.f32 %v2328_v26, %v2351_v36 }
  0x99   :  { %263 = vrot.lane.b32.xlu0 %v199_v27, %s2220_s27 }
  0x9c   :  { %v190_v30 = vpop.f32.mrf.mxu1 }
  0x9d   :  { %v2338_v31 = vadd.f32 %v190_v30, %v2323_v23 }
  0x9f   :  { %v200_v32 = vmul.f32 %v2338_v31, %v2316_v20  ;;  %v198_v33 = vmul.f32 %v2338_v31, %v2320_v22  ;;  %v196_v34 = vmul.f32 %v2338_v31, %v2333_v28  ;;  %v194_v41 = vmul.f32 %v2338_v31, %v2362_v40 }
  0xa1   :  { %265 = vrot.lane.b32.xlu2 %v200_v32, %s2220_s27  ;;  %261 = vrot.lane.b32.xlu1 %v198_v33, %s2220_s27  ;;  %v234_v32 = vld [vmem:[#allocation7 + $0x158] sm:$0xff] }
  0xa2   :  { %257 = vrot.lane.b32.xlu0 %v196_v34, %s2220_s27 }
  0xa9   :  { %259 = vrot.lane.b32.xlu2 %v197_v38, %s2220_s27  ;;  %255 = vrot.lane.b32.xlu1 %v195_v37, %s2220_s27 }
  0xaa   :  { %251 = vrot.lane.b32.xlu0 %v193_v39, %s2220_s27  ;;  %v2425_v39 = vld [vmem:[#allocation7 + $0x198] sm:$0xff] }
  0xab   :  { %341 = vmatpush.msra.mxu3 %v2425_v39 }
  0xb1   :  { %253 = vrot.lane.b32.xlu2 %v194_v41, %s2220_s27  ;;  %v2428_v41 = vld [vmem:[#allocation7 + $0x190] sm:$0xff] }
  0xb2   :  { %215 = vrot.lane.b32.xlu0 %v2274_v7, %s2221_s28  ;;  %342 = vmatpush.msra.mxu3 %v2428_v41 }
  0xba   :  { %213 = vrot.lane.b32.xlu0 %v2291_v14, %s2221_s28 }
  0xc2   :  { %211 = vrot.lane.b32.xlu0 %v2267_v4, %s2221_s28 }
  0xca   :  { %209 = vrot.lane.b32.xlu0 %v2286_v13, %s2221_s28 }
  0xd2   :  { %207 = vrot.lane.b32.xlu0 %v2283_v12, %s2221_s28 }
  0xda   :  { %201 = vrot.lane.b32.xlu0 %v2303_v18, %s2221_s28 }
  0xfb   :  { %v266_v42 = vpop.permute.xlu2 %265 }
  0xfc   :  { %1861 = vmatpush.xpose.msk.msra.mxu2 %vm73_vm0, %v266_v42  ;;  %v2431_v42 = vld [vmem:[#allocation7 + $0x188] sm:$0xff] }
  0xfd   :  { %343 = vmatpush.msra.mxu3 %v2431_v42 }
 0x103   :  { %v260_v46 = vpop.permute.xlu2 %259 }
 0x10b   :  { %v264_v43 = vpop.permute.xlu0 %263  ;;  %v254_v49 = vpop.permute.xlu2 %253 }
 0x10c   :  { %1862 = vmatpush.xpose.msk.msra.mxu2 %vm73_vm0, %v264_v43  ;;  %v2433_v43 = vld [vmem:[#allocation7 + $0x180] sm:$0xff] }
 0x10d   :  { %344 = vmatpush.msra.mxu3 %v2433_v43 }
 0x113   :  { %v262_v44 = vpop.permute.xlu1 %261 }
 0x114   :  { %v258_v45 = vpop.permute.xlu0 %257  ;;  %1863 = vmatpush.xpose.msk.msra.mxu2 %vm73_vm0, %v262_v44  ;;  %v2437_v44 = vld [vmem:[#allocation7 + $0x178] sm:$0xff] }
 0x115   :  { %345 = vmatpush.msra.mxu3 %v2437_v44 }
 0x118   :  { %1864 = vmatpush.xpose.msk.msra.mxu2 %vm73_vm0, %v260_v46 }
 0x11b   :  { %v256_v48 = vpop.permute.xlu1 %255 }
 0x11c   :  { %v252_v47 = vpop.permute.xlu0 %251  ;;  %1865 = vmatpush.xpose.msk.msra.mxu2 %vm73_vm0, %v258_v45  ;;  %v2440_v45 = vld [vmem:[#allocation7 + $0x170] sm:$0xff] }
 0x11d   :  { %346 = vmatpush.msra.mxu3 %v2440_v45 }
 0x120   :  { %1866 = vmatpush.xpose.msk.msra.mxu2 %vm73_vm0, %v256_v48 }
 0x124   :  { %v2385_v50 = vpop.permute.xlu0 %215  ;;  %1867 = vmatpush.xpose.msk.msra.mxu2 %vm73_vm0, %v254_v49 }
 0x125   :  { %v232_v52 = vmul.f32 %v2385_v50, %v2338_v31 }
 0x128   :  { %1868 = vmatpush.xpose.msk.msra.mxu2 %vm73_vm0, %v252_v47 }
 0x12b   :  { %1869 = vmatmul.msk.f32.vlgmr.msra.gmra.mxu2 %vm73_vm0, %v2328_v26 }
 0x12c   :  { %v2391_v51 = vpop.permute.xlu0 %213 }
 0x12d   :  { %v231_v53 = vmul.f32 %v2391_v51, %v2328_v26 }
 0x12f   :  { %v1957_v54 = vpack.i.bf16 %v231_v53, %v232_v52 }
 0x131   :  { %1958 = vrot.lane.b32.xlu0 %v1957_v54, %s2221_s28 }
 0x133   :  { %1870 = vmatmul.msk.f32.gmra.mxu2 %vm73_vm0, %v2338_v31 }
 0x134   :  { %v2400_v55 = vpop.permute.xlu0 %211 }
 0x135   :  { %v230_v57 = vmul.f32 %v2400_v55, %v2338_v31 }
 0x13c   :  { %v2402_v56 = vpop.permute.xlu0 %209 }
 0x13d   :  { %v229_v58 = vmul.f32 %v2402_v56, %v2328_v26 }
 0x13f   :  { %v1962_v59 = vpack.i.bf16 %v229_v58, %v230_v57 }
 0x141   :  { %1963 = vrot.lane.b32.xlu0 %v1962_v59, %s2221_s28 }
 0x144   :  { %v2409_v60 = vpop.permute.xlu0 %207 }
 0x145   :  { %v228_v58 = vmul.f32 %v2409_v60, %v2338_v31 }
 0x14c   :  { %v2411_v61 = vpop.permute.xlu0 %201 }
 0x1a3   :  { %v1959_v62 = vpop.permute.xlu0 %1958 }
 0x1a4   :  { %v1960_v63 = vunpack.i.l.bf16 %v1959_v62  ;;  %v1961_v0 = vunpack.i.h.bf16 %v1959_v62 }
 0x1a6   :  { %430 = vmatpush.msrb.mxu0 %v1960_v63 }
 0x1a8   :  { %431 = vmatpush.msrb.mxu0 %v1961_v0 }
 0x1ae   :  { %v306_v6 = vpop.f32.mrf.mxu2 }
 0x1af   :  { %v307_v8 = vadd.f32 %v306_v6, %v233_v2  ;;  %v225_v2 = vmul.f32 %v2411_v61, %v2328_v26 }
 0x1b1   :  { %v313_v10 = vsel %vm312_vm1, %v307_v8, -inf }
 0x1b2   :  { %314 = vmax.xlane.f32.xlu1 %v313_v10 }
 0x1b3   :  { %v1964_v27 = vpop.permute.xlu0 %1963 }
 0x1b4   :  { %v1965_v30 = vunpack.i.l.bf16 %v1964_v27  ;;  %v1966_v34 = vunpack.i.h.bf16 %v1964_v27 }
 0x1b6   :  { %432 = vmatpush.msrb.mxu0 %v1965_v30  ;;  %v309_v33 = vpop.f32.mrf.mxu2 }
 0x1b7   :  { %v310_v37 = vadd.f32 %v309_v33, %v234_v32  ;;  %v97_v32 = vpop.f32.mrf.mxu0  ;;  %v2465_v33 = vld [vmem:[#allocation7 + $0x78] sm:$0xff] }
 0x1b8   :  { %433 = vmatpush.msrb.mxu0 %v1966_v34  ;;  %468 = vmatpush.msrb.mxu1 %v2465_v33 }
 0x1b9   :  { %v316_v38 = vsel %vm312_vm1, %v310_v37, -inf }
 0x1ba   :  { %317 = vmax.xlane.f32.xlu2 %v316_v38 }
 0x1bf   :  { %v100_v34 = vpop.f32.mrf.mxu0 }
 0x1cb   :  { %203 = vrot.lane.b32.xlu1 %v2308_v19, %s2221_s28 }
 0x1d2   :  { %205 = vrot.lane.b32.xlu2 %v2301_v17, %s2221_s28 }
 0x225   :  { %v315_v46 = vpop.xlane.xlu1 %314 }
 0x226   :  { %v319_v47 = vsub.f32 %v307_v8, %v315_v46 }
 0x228   :  { %v321_v48 = vmul.f32 1.442695, %v319_v47 }
 0x22a   :  { %2017 = vpow2.f32 %v321_v48 }
 0x22d   :  { %v318_v49 = vpop.xlane.xlu2 %317 }
 0x22e   :  { %v320_v52 = vsub.f32 %v310_v37, %v318_v49  ;;  %v72_v37 = vperm.slane %v2318_v21, 1  ;;  %v2478_v49 = vld [vmem:[#allocation7 + $0x68] sm:$0xff] }
 0x230   :  { %v2443_v53 = vpop.eup %2017  ;;  %v323_v54 = vmul.f32 1.442695, %v320_v52  ;;  %v2472_v46 = vadd.f32 %v100_v34, %v72_v37  ;;  %v2480_v52 = vld [vmem:[#allocation7 + $0x60] sm:$0xff] }
 0x231   :  { %1871 = vmatmul.msk.f32.vlgmr.msra.gmra.mxu3 %vm312_vm1, %v2443_v53 }
 0x232   :  { %2019 = vpow2.f32 %v323_v54  ;;  %v2476_v48 = vmul.f32 %v2274_v7, %v2472_v46 }
 0x235   :  { %v2447_v57 = vpop.permute.xlu2 %205 }
 0x236   :  { %v227_v59 = vmul.f32 %v2447_v57, %v2328_v26  ;;  %v2469_v26 = vld [vmem:[#allocation7 + $0x70] sm:$0xff] }
 0x237   :  { %469 = vmatpush.msrb.mxu1 %v2469_v26 }
 0x238   :  { %v2453_v62 = vpop.eup %2019  ;;  %v1967_v63 = vpack.i.bf16 %v227_v59, %v228_v58  ;;  %v2483_v58 = vadd.f32 %v97_v32, %v72_v37 }
 0x239   :  { %1872 = vmatmul.msk.f32.gmra.mxu3 %vm312_vm1, %v2453_v62  ;;  %470 = vmatpush.msrb.mxu1 %v2478_v49 }
 0x23a   :  { %1968 = vrot.lane.b32.xlu2 %v1967_v63, %s2221_s28  ;;  %v2490_v7 = vmul.f32 %v2291_v14, %v2483_v58  ;;  %v2506_v37 = vmul.f32 %v2286_v13, %v2483_v58 }
 0x23b   :  { %471 = vmatpush.msrb.mxu1 %v2480_v52 }
 0x23c   :  { %3070 = vst [vmem:[#allocation13_spill] sm:$0xff] %v2506_v37 }
 0x23d   :  { %v2458_v0 = vpop.permute.xlu1 %203  ;;  %685 = vmatpush.msra.mxu1 %v2414_v15 }
 0x23e   :  { %v226_v6 = vmul.f32 %v2458_v0, %v2338_v31 }
 0x23f   :  { %686 = vmatpush.msra.mxu1 %v2416_v24 }
 0x240   :  { %v1972_v8 = vpack.i.bf16 %v225_v2, %v226_v6 }
 0x241   :  { %687 = vmatpush.msra.mxu1 %v2425_v39 }
 0x242   :  { %1973 = vrot.lane.b32.xlu1 %v1972_v8, %s2221_s28 }
 0x243   :  { %688 = vmatpush.msra.mxu1 %v2428_v41 }
 0x245   :  { %689 = vmatpush.msra.mxu1 %v2431_v42 }
 0x247   :  { %690 = vmatpush.msra.mxu1 %v2433_v43 }
 0x249   :  { %691 = vmatpush.msra.mxu1 %v2437_v44 }
 0x24b   :  { %692 = vmatpush.msra.mxu1 %v2440_v45 }
 0x294   :  { %v1969_v10 = vpop.permute.xlu2 %1968 }
 0x295   :  { %v1970_v27 = vunpack.i.l.bf16 %v1969_v10  ;;  %v1971_v30 = vunpack.i.h.bf16 %v1969_v10  ;;  %v2498_v10 = vmul.f32 %v2267_v4, %v2472_v46 }
 0x297   :  { %434 = vmatpush.msrb.mxu0 %v1970_v27  ;;  %3069 = vst [vmem:[#allocation12_spill] sm:$0xff] %v2498_v10 }
 0x299   :  { %435 = vmatpush.msrb.mxu0 %v1971_v30 }
 0x2b4   :  { %v348_v38 = vpop.f32.mrf.mxu3  ;;  %v1974_v31 = vpop.permute.xlu1 %1973 }
 0x2b5   :  { %2021 = vrcp.f32 %v348_v38  ;;  %v1975_v47 = vunpack.i.l.bf16 %v1974_v31  ;;  %v1976_v54 = vunpack.i.h.bf16 %v1974_v31  ;;  %v365_v8 = vand.u32 2147483648, %v348_v38 }
 0x2b6   :  { %v363_v27 = vand.u32 2147483647, %v348_v38  ;;  %vm359_vm3 = vweird.f32 %v348_v38 }
 0x2b7   :  { %436 = vmatpush.msrb.mxu0 %v1975_v47  ;;  %v366_v34 = vor.u32 1.1754944e-38, %v365_v8 }
 0x2b8   :  { %vm364_vm5 = vcmp.eq.f32.partialorder %v363_v27, 8.507059e+37 }
 0x2b9   :  { %437 = vmatpush.msrb.mxu0 %v1976_v54 }
 0x2bb   :  { %v2022_v59 = vpop.eup %2021  ;;  %1879 = vmatpush.xpose.msk.msra.mxu0 %vm73_vm0, %v2476_v48 }
 0x2bc   :  { %v355_v63 = vmul.f32 %v2022_v59, %v348_v38  ;;  %v351_v2 = vpop.f32.mrf.mxu3  ;;  %vm360_vm2 = vweird.f32 %v2022_v59 }
 0x2bd   :  { %2023 = vrcp.f32 %v351_v2  ;;  %vm361_vm4 = vmor %vm359_vm3, %vm360_vm2  ;;  %vm374_vm7 = vweird.f32 %v351_v2 }
 0x2be   :  { %v356_v6 = vsub.f32 1.0, %v355_v63  ;;  %v380_v63 = vand.u32 2147483648, %v351_v2 }
 0x2bf   :  { %1880 = vmatpush.xpose.msk.msra.mxu0 %vm73_vm0, %v2490_v7 }
 0x2c0   :  { %v357_v14 = vmul.f32 %v2022_v59, %v356_v6  ;;  %v2515_v6 = vmul.f32 %v2283_v12, %v2472_v46  ;;  %v2524_v12 = vmul.f32 %v2301_v17, %v2483_v58  ;;  %v2538_v17 = vmul.f32 %v2303_v18, %v2483_v58 }
 0x2c2   :  { %v358_v30 = vadd.f32 %v2022_v59, %v357_v14  ;;  %3071 = vst [vmem:[#allocation14_spill] sm:$0xff] %v2515_v6 }
 0x2c3   :  { %v2024_v32 = vpop.eup %2023  ;;  %1881 = vmatpush.xpose.msk.msra.mxu0 %vm73_vm0, %v2498_v10  ;;  %3072 = vst [vmem:[#allocation15_spill] sm:$0xff] %v2524_v12 }
 0x2c4   :  { %v370_v4 = vmul.f32 %v2024_v32, %v351_v2  ;;  %v362_v31 = vsel %vm361_vm4, %v2022_v59, %v358_v30  ;;  %vm375_vm6 = vweird.f32 %v2024_v32  ;;  %v378_v59 = vand.u32 2147483647, %v351_v2  ;;  %3074 = vst [vmem:[#allocation17_spill] sm:$0xff] %v2538_v17 }
 0x2c5   :  { %v367_v47 = vsel %vm364_vm5, %v366_v34, %v362_v31  ;;  %vm376_vm8 = vmor %vm374_vm7, %vm375_vm6  ;;  %v2531_v2 = vmul.f32 %v2308_v19, %v2472_v46  ;;  %v2545_v19 = vperm.slane %v2318_v21, 4 }
 0x2c6   :  { %v371_v54 = vsub.f32 1.0, %v370_v4  ;;  %v368_v38 = vmul.f32 %v2443_v53, %v367_v47  ;;  %v381_v53 = vor.u32 1.1754944e-38, %v380_v63  ;;  %vm379_vm9 = vcmp.eq.f32.partialorder %v378_v59, 8.507059e+37 }
 0x2c7   :  { %1882 = vmatpush.xpose.msk.msra.mxu0 %vm73_vm0, %v2506_v37  ;;  %3073 = vst [vmem:[#allocation16_spill] sm:$0xff] %v2531_v2 }
 0x2c8   :  { %v372_v13 = vmul.f32 %v2024_v32, %v371_v54  ;;  %1873 = vmatmul.msk.f32.vlgmr.msrb.gmra.mxu0 %vm312_vm1, %v368_v38  ;;  %3075 = vst [vmem:[#allocation18_spill] sm:$0xff] %v2545_v19 }
 0x2ca   :  { %v373_v8 = vadd.f32 %v2024_v32, %v372_v13  ;;  %v2222_v13 = vmov 32.0  }
 0x2cb   :  { %1883 = vmatpush.xpose.msk.msra.mxu0 %vm73_vm0, %v2515_v6  ;;  %2025 = vrcp.f32 %v2222_v13  ;;  %v157_v13 = vmul.f32 %v2325_v25, %v2483_v58 }
 0x2cc   :  { %v377_v14 = vsel %vm376_vm8, %v2024_v32, %v373_v8 }
 0x2cd   :  { %v382_v27 = vsel %vm379_vm9, %v381_v53, %v377_v14 }
 0x2ce   :  { %v383_v30 = vmul.f32 %v2453_v62, %v382_v27 }
 0x2cf   :  { %1884 = vmatpush.xpose.msk.msra.mxu0 %vm73_vm0, %v2524_v12 }
 0x2d0   :  { %1874 = vmatmul.msk.f32.gmra.mxu0 %vm312_vm1, %v383_v30 }
 0x2d1   :  { %v2026_v59 = vpop.eup %2025 }
 0x2d2   :  { %v488_v8 = vmul.f32 32.0, %v2026_v59  ;;  %vm492_vm10 = vweird.f32 %v2026_v59 }
 0x2d3   :  { %1885 = vmatpush.xpose.msk.msra.mxu0 %vm73_vm0, %v2531_v2 }
 0x2d4   :  { %v489_v53 = vsub.f32 1.0, %v488_v8  ;;  %v151_v8 = vmul.f32 %v2351_v36, %v2483_v58 }
 0x2d6   :  { %v490_v14 = vmul.f32 %v2026_v59, %v489_v53 }
 0x2d7   :  { %1886 = vmatpush.xpose.msk.msra.mxu0 %vm73_vm0, %v2538_v17 }
 0x2d8   :  { %v491_v27 = vadd.f32 %v2026_v59, %v490_v14 }
 0x345   :  { %v439_v62 = vpop.f32.mrf.mxu0 }
 0x346   :  { %1875 = vmatmul.msk.f32.vlgmr.msrb.gmra.mxu1 %vm73_vm0, %v439_v62 }
 0x34d   :  { %v442_v32 = vpop.f32.mrf.mxu0 }
 0x34e   :  { %1876 = vmatmul.msk.f32.gmra.mxu1 %vm73_vm0, %v442_v32 }
 0x3c3   :  { %v473_v34 = vpop.f32.mrf.mxu1 }
 0x3c4   :  { %v474_v4 = vadd.f32 %v473_v34, %v2545_v19 }
 0x3c6   :  { %v479_v31 = vadd.f32 %v474_v4, %v2281_v11  ;;  %v2553_v11 = vsel %vm492_vm10, %v2026_v59, %v491_v27  ;;  %v2577_v27 = vld [vmem:[#allocation7 + $0x58] sm:$0xff] }
 0x3c7   :  { %593 = vmatpush.msrb.mxu3 %v2577_v27 }
 0x3c8   :  { %v481_v18 = vsel %vm73_vm0, %v479_v31, 0.0 }
 0x3c9   :  { %482 = vadd.xlane.f32.xlu0 %v481_v18 }
 0x3cb   :  { %v476_v47 = vpop.f32.mrf.mxu1 }
 0x3cc   :  { %v477_v54 = vadd.f32 %v476_v47, %v2545_v19 }
 0x3ce   :  { %v480_v38 = vadd.f32 %v477_v54, %v2299_v16 }
 0x3d0   :  { %v484_v63 = vsel %vm73_vm0, %v480_v38, 0.0 }
 0x3d1   :  { %485 = vadd.xlane.f32.xlu2 %v484_v63 }
 0x43c   :  { %v483_v30 = vpop.xlane.xlu0 %482 }
 0x43d   :  { %v494_v62 = vmul.f32 %v2553_v11, %v483_v30 }
 0x43f   :  { %v2556_v32 = vsub.f32 %v479_v31, %v494_v62  ;;  %v158_v31 = vmul.f32 %v2316_v20, %v2472_v46 }
 0x441   :  { %v498_v16 = vmul.f32 %v2556_v32, %v2556_v32  ;;  %v1977_v59 = vpack.i.bf16 %v157_v13, %v158_v31 }
 0x443   :  { %v500_v34 = vsel %vm73_vm0, %v498_v16, 0.0  ;;  %v2581_v16 = vld [vmem:[#allocation7 + $0x50] sm:$0xff] }
 0x444   :  { %501 = vadd.xlane.f32.xlu1 %v500_v34  ;;  %v486_v4 = vpop.xlane.xlu2 %485  ;;  %v2583_v34 = vld [vmem:[#allocation7 + $0x48] sm:$0xff]  ;;  %594 = vmatpush.msrb.mxu3 %v2581_v16 }
 0x445   :  { %v495_v18 = vmul.f32 %v2553_v11, %v486_v4  ;;  %v2586_v4 = vld [vmem:[#allocation7 + $0x40] sm:$0xff] }
 0x446   :  { %595 = vmatpush.msrb.mxu3 %v2583_v34 }
 0x447   :  { %v2562_v47 = vsub.f32 %v480_v38, %v495_v18  ;;  %v152_v38 = vmul.f32 %v2362_v40, %v2472_v46 }
 0x448   :  { %596 = vmatpush.msrb.mxu3 %v2586_v4 }
 0x449   :  { %v499_v54 = vmul.f32 %v2562_v47, %v2562_v47  ;;  %v1992_v53 = vpack.i.bf16 %v151_v8, %v152_v38 }
 0x44b   :  { %v503_v63 = vsel %vm73_vm0, %v499_v54, 0.0 }
 0x44c   :  { %504 = vadd.xlane.f32.xlu0 %v503_v63 }
 0x460   :  { %1978 = vrot.lane.b32.xlu0 %v1977_v59, %s2220_s27 }
 0x468   :  { %1993 = vrot.lane.b32.xlu0 %v1992_v53, %s2220_s27 }
 0x4b7   :  { %v502_v14 = vpop.xlane.xlu1 %501 }
 0x4b8   :  { %v506_v30 = vmul.f32 %v502_v14, %v2553_v11 }
 0x4ba   :  { %v508_v62 = vadd.f32 1e-05, %v506_v30 }
 0x4bc   :  { %2027 = vrsqrt.f32 %v508_v62  ;;  %vm517_vm11 = vcmp.eq.f32.partialorder %v508_v62, inf  ;;  %v520_v2 = vand.u32 2147483648, %v508_v62  ;;  %vm519_vm12 = vcmp.eq.f32.partialorder %v508_v62, 0.0 }
 0x4bf   :  { %v505_v18 = vpop.xlane.xlu0 %504 }
 0x4c0   :  { %v507_v54 = vmul.f32 %v505_v18, %v2553_v11 }
 0x4c2   :  { %v2028_v63 = vpop.eup %2027  ;;  %v509_v31 = vadd.f32 1e-05, %v507_v54 }
 0x4c3   :  { %v511_v13 = vmul.f32 %v2028_v63, %v508_v62 }
 0x4c4   :  { %2029 = vrsqrt.f32 %v509_v31  ;;  %vm529_vm13 = vcmp.eq.f32.partialorder %v509_v31, inf  ;;  %vm531_vm14 = vcmp.eq.f32.partialorder %v509_v31, 0.0 }
 0x4c5   :  { %v512_v59 = vmul.f32 %v2028_v63, %v511_v13 }
 0x4c7   :  { %v513_v8 = vmul.f32 0.5, %v512_v59 }
 0x4c9   :  { %v514_v38 = vsub.f32 1.5, %v513_v8  ;;  %v532_v8 = vand.u32 2147483648, %v509_v31 }
 0x4ca   :  { %v2030_v53 = vpop.eup %2029 }
 0x4cb   :  { %v515_v14 = vmul.f32 %v2028_v63, %v514_v38  ;;  %v523_v30 = vmul.f32 %v2030_v53, %v509_v31 }
 0x4cd   :  { %v516_v19 = vmul.f32 %v515_v14, %v508_v62  ;;  %v524_v17 = vmul.f32 %v2030_v53, %v523_v30  ;;  %v2599_v30 = vld [vmem:[#allocation7 + $0x108] sm:$0xff] }
 0x4cf   :  { %v525_v12 = vmul.f32 0.5, %v524_v17  ;;  %v518_v6 = vsel %vm517_vm11, %v508_v62, %v516_v19 }
 0x4d0   :  { %v521_v37 = vsel %vm519_vm12, %v520_v2, %v518_v6 }
 0x4d1   :  { %v526_v10 = vsub.f32 1.5, %v525_v12  ;;  %2031 = vrcp.f32 %v521_v37  ;;  %v545_v19 = vand.u32 2147483648, %v521_v37  ;;  %v543_v62 = vand.u32 2147483647, %v521_v37 }
 0x4d2   :  { %v2591_v18 = vpop.permute.xlu0 %1978  ;;  %vm539_vm2 = vweird.f32 %v521_v37 }
 0x4d3   :  { %3076 = vst [vmem:[#allocation19_spill] sm:$0xff] %v2591_v18  ;;  %v3049_v54 = vunpack.i.l.bf16 %v2591_v18  ;;  %v527_v13 = vmul.f32 %v2030_v53, %v526_v10  ;;  %v3050_v63 = vunpack.i.h.bf16 %v2591_v18  ;;  %vm544_vm4 = vcmp.eq.f32.partialorder %v543_v62, 8.507059e+37 }
 0x4d5   :  { %776 = vmatpush.msrb.mxu2 %v3049_v54  ;;  %v528_v59 = vmul.f32 %v527_v13, %v509_v31  ;;  %v546_v13 = vor.u32 1.1754944e-38, %v545_v19 }
 0x4d7   :  { %v2032_v38 = vpop.eup %2031  ;;  %777 = vmatpush.msrb.mxu2 %v3050_v63  ;;  %v530_v6 = vsel %vm529_vm13, %v509_v31, %v528_v59  ;;  %v2602_v59 = vperm.slane %v2318_v21, 7 }
 0x4d8   :  { %v535_v12 = vmul.f32 %v2032_v38, %v521_v37  ;;  %v533_v2 = vsel %vm531_vm14, %v532_v8, %v530_v6  ;;  %vm540_vm15 = vweird.f32 %v2032_v38 }
 0x4d9   :  { %2033 = vrcp.f32 %v533_v2  ;;  %vm541_vm3 = vmor %vm539_vm2, %vm540_vm15  ;;  %3077 = vst [vmem:[#allocation20_spill] sm:$0xff] %v2602_v59  ;;  %v558_v18 = vand.u32 2147483647, %v533_v2  ;;  %vm554_vm6 = vweird.f32 %v533_v2 }
 0x4da   :  { %v536_v17 = vsub.f32 1.0, %v535_v12  ;;  %v2606_v12 = vperm.slane %v2599_v30, 0 }
 0x4db   :  { %vm559_vm8 = vcmp.eq.f32.partialorder %v558_v18, 8.507059e+37 }
 0x4dc   :  { %v537_v10 = vmul.f32 %v2032_v38, %v536_v17  ;;  %3078 = vst [vmem:[#allocation21_spill] sm:$0xff] %v2606_v12 }
 0x4de   :  { %v538_v53 = vadd.f32 %v2032_v38, %v537_v10  ;;  %v560_v10 = vand.u32 2147483648, %v533_v2 }
 0x4df   :  { %v2034_v14 = vpop.eup %2033 }
 0x4e0   :  { %v542_v54 = vsel %vm541_vm3, %v2032_v38, %v538_v53  ;;  %v550_v31 = vmul.f32 %v2034_v14, %v533_v2  ;;  %vm555_vm5 = vweird.f32 %v2034_v14  ;;  %v561_v62 = vor.u32 1.1754944e-38, %v560_v10 }
 0x4e1   :  { %v547_v8 = vsel %vm544_vm4, %v546_v13, %v542_v54  ;;  %vm556_vm7 = vmor %vm554_vm6, %vm555_vm5 }
 0x4e2   :  { %v548_v6 = vmul.f32 %v547_v8, %v2556_v32  ;;  %v551_v17 = vsub.f32 1.0, %v550_v31 }
 0x4e4   :  { %v565_v37 = vmul.f32 %v2602_v59, %v548_v6  ;;  %v552_v63 = vmul.f32 %v2034_v14, %v551_v17 }
 0x4e6   :  { %v2610_v38 = vadd.f32 %v2606_v12, %v565_v37  ;;  %v553_v19 = vadd.f32 %v2034_v14, %v552_v63  ;;  %v2622_v63 = vperm.slane %v2318_v21, 3  ;;  %v605_v37 = vld [vmem:[#allocation7 + $0x168] sm:$0xff] }
 0x4e8   :  { %1877 = vmatmul.msk.f32.vlgmr.msrb.gmra.mxu3 %vm73_vm0, %v2610_v38  ;;  %v557_v32 = vsel %vm556_vm7, %v2034_v14, %v553_v19  ;;  %3079 = vst [vmem:[#allocation22_spill] sm:$0xff] %v2622_v63 }
 0x4e9   :  { %v562_v54 = vsel %vm559_vm8, %v561_v62, %v557_v32 }
 0x4ea   :  { %v563_v53 = vmul.f32 %v562_v54, %v2562_v47  ;;  %v604_v47 = vld [vmem:[#allocation7 + $0x160] sm:$0xff]  ;;  %v155_v54 = vmul.f32 %v2335_v29, %v2483_v58 }
 0x4ec   :  { %v566_v13 = vmul.f32 %v2602_v59, %v563_v53  ;;  %v156_v53 = vmul.f32 %v2320_v22, %v2472_v46 }
 0x4ee   :  { %v2617_v31 = vadd.f32 %v2606_v12, %v566_v13  ;;  %v1982_v13 = vpack.i.bf16 %v155_v54, %v156_v53 }
 0x4f0   :  { %1878 = vmatmul.msk.f32.gmra.mxu3 %vm73_vm0, %v2617_v31 }
 0x56b   :  { %v598_v2 = vpop.f32.mrf.mxu3 }
 0x56c   :  { %v599_v8 = vadd.f32 %v598_v2, %v2622_v63  ;;  %v153_v2 = vmul.f32 %v2349_v35, %v2483_v58 }
 0x56e   :  { %1887 = vmatmul.msk.f32.vlgmr.msra.gmra.mxu0 %vm73_vm0, %v599_v8  ;;  %v154_v8 = vmul.f32 %v2333_v28, %v2472_v46 }
 0x573   :  { %v601_v18 = vpop.f32.mrf.mxu3 }
 0x574   :  { %v602_v14 = vadd.f32 %v601_v18, %v2622_v63  ;;  %v1987_v18 = vpack.i.bf16 %v153_v2, %v154_v8 }
 0x576   :  { %1888 = vmatmul.msk.f32.gmra.mxu0 %vm73_vm0, %v602_v14 }
 0x5eb   :  { %v653_v6 = vpop.f32.mrf.mxu0 }
 0x5ec   :  { %v654_v17 = vadd.f32 %v653_v6, %v604_v47 }
 0x5ee   :  { %v659_v10 = vsel %vm312_vm1, %v654_v17, -inf }
 0x5ef   :  { %660 = vmax.xlane.f32.xlu2 %v659_v10 }
 0x5f3   :  { %v656_v19 = vpop.f32.mrf.mxu0 }
 0x5f4   :  { %v657_v62 = vadd.f32 %v656_v19, %v605_v37 }
 0x5f6   :  { %v662_v32 = vsel %vm312_vm1, %v657_v62, -inf }
 0x5f7   :  { %663 = vmax.xlane.f32.xlu1 %v662_v32 }
 0x607   :  { %1983 = vrot.lane.b32.xlu2 %v1982_v13, %s2220_s27  ;;  %v2653_v13 = vpop.permute.xlu0 %1993 }
 0x608   :  { %v3054_v8 = vunpack.i.l.bf16 %v2653_v13 }
 0x610   :  { %1988 = vrot.lane.b32.xlu1 %v1987_v18, %s2220_s27  ;;  %v3053_v18 = vunpack.i.h.bf16 %v2653_v13 }
 0x662   :  { %v661_v14 = vpop.xlane.xlu2 %660 }
 0x663   :  { %v665_v47 = vsub.f32 %v654_v17, %v661_v14  ;;  %v2666_v14 = vld [vmem:[#allocation7 + $0x98] sm:$0xff] }
 0x664   :  { %3080 = vst [vmem:[#allocation23_spill] sm:$0xff] %v2666_v14  ;;  %814 = vmatpush.msra.mxu3 %v2666_v14 }
 0x665   :  { %v667_v6 = vmul.f32 1.442695, %v665_v47  ;;  %v2668_v47 = vld [vmem:[#allocation7 + $0x90] sm:$0xff] }
 0x666   :  { %3081 = vst [vmem:[#allocation24_spill] sm:$0xff] %v2668_v47  ;;  %815 = vmatpush.msra.mxu3 %v2668_v47 }
 0x667   :  { %2035 = vpow2.f32 %v667_v6  ;;  %v2671_v6 = vld [vmem:[#allocation7 + $0x88] sm:$0xff] }
 0x668   :  { %3082 = vst [vmem:[#allocation25_spill] sm:$0xff] %v2671_v6  ;;  %816 = vmatpush.msra.mxu3 %v2671_v6 }
 0x66a   :  { %v664_v10 = vpop.xlane.xlu1 %663  ;;  %v2640_v37 = vpop.permute.xlu2 %1983 }
 0x66b   :  { %v666_v19 = vsub.f32 %v657_v62, %v664_v10  ;;  %v3058_v32 = vunpack.i.l.bf16 %v2640_v37  ;;  %v3057_v46 = vunpack.i.h.bf16 %v2640_v37 }
 0x66d   :  { %v2036_v54 = vpop.eup %2035  ;;  %v669_v53 = vmul.f32 1.442695, %v666_v19  ;;  %778 = vmatpush.msrb.mxu2 %v3058_v32  ;;  %v2674_v19 = vld [vmem:[#allocation7 + $0x80] sm:$0xff] }
 0x66e   :  { %1889 = vmatmul.msk.f32.vlgmr.msra.gmra.mxu1 %vm312_vm1, %v2036_v54  ;;  %3083 = vst [vmem:[#allocation26_spill] sm:$0xff] %v2674_v19  ;;  %817 = vmatpush.msra.mxu3 %v2674_v19 }
 0x66f   :  { %2037 = vpow2.f32 %v669_v53  ;;  %779 = vmatpush.msrb.mxu2 %v3057_v46 }
 0x670   :  { %1085 = vmatpush.msrb.mxu3 %v2262_v1 }
 0x672   :  { %1086 = vmatpush.msrb.mxu3 %v2265_v3 }
 0x674   :  { %1087 = vmatpush.msrb.mxu3 %v2269_v5 }
 0x675   :  { %v2038_v58 = vpop.eup %2037 }
 0x676   :  { %1890 = vmatmul.msk.f32.gmra.mxu1 %vm312_vm1, %v2038_v58  ;;  %1088 = vmatpush.msrb.mxu3 %v2276_v9 }
 0x682   :  { %v2650_v17 = vpop.permute.xlu1 %1988 }
 0x683   :  { %v3056_v62 = vunpack.i.l.bf16 %v2650_v17  ;;  %v3055_v2 = vunpack.i.h.bf16 %v2650_v17 }
 0x685   :  { %780 = vmatpush.msrb.mxu2 %v3056_v62 }
 0x687   :  { %781 = vmatpush.msrb.mxu2 %v3055_v2 }
 0x689   :  { %782 = vmatpush.msrb.mxu2 %v3054_v8 }
 0x68b   :  { %783 = vmatpush.msrb.mxu2 %v3053_v18 }
 0x6eb   :  { %v694_v10 = vpop.f32.mrf.mxu1 }
 0x6ec   :  { %2039 = vrcp.f32 %v694_v10  ;;  %v711_v62 = vand.u32 2147483648, %v694_v10  ;;  %v709_v32 = vand.u32 2147483647, %v694_v10  ;;  %vm705_vm10 = vweird.f32 %v694_v10 }
 0x6ee   :  { %v712_v1 = vor.u32 1.1754944e-38, %v711_v62  ;;  %vm710_vm12 = vcmp.eq.f32.partialorder %v709_v32, 8.507059e+37 }
 0x6f2   :  { %v2040_v53 = vpop.eup %2039 }
 0x6f3   :  { %v701_v18 = vmul.f32 %v2040_v53, %v694_v10  ;;  %v697_v8 = vpop.f32.mrf.mxu1  ;;  %vm706_vm9 = vweird.f32 %v2040_v53 }
 0x6f4   :  { %2041 = vrcp.f32 %v697_v8  ;;  %vm707_vm11 = vmor %vm705_vm10, %vm706_vm9  ;;  %v726_v5 = vand.u32 2147483648, %v697_v8  ;;  %v724_v9 = vand.u32 2147483647, %v697_v8  ;;  %vm720_vm14 = vweird.f32 %v697_v8 }
 0x6f5   :  { %v702_v2 = vsub.f32 1.0, %v701_v18 }
 0x6f6   :  { %v727_v18 = vor.u32 1.1754944e-38, %v726_v5  ;;  %vm725_vm2 = vcmp.eq.f32.partialorder %v724_v9, 8.507059e+37  ;;  %v2711_v5 = vld [vmem:[#allocation7 + $0xb8] sm:$0xff]  ;;  %v2713_v9 = vld [vmem:[#allocation7 + $0xb0] sm:$0xff] }
 0x6f7   :  { %v703_v46 = vmul.f32 %v2040_v53, %v702_v2  ;;  %932 = vmatpush.msrb.mxu1 %v2711_v5 }
 0x6f9   :  { %v704_v63 = vadd.f32 %v2040_v53, %v703_v46  ;;  %933 = vmatpush.msrb.mxu1 %v2713_v9 }
 0x6fa   :  { %v2042_v12 = vpop.eup %2041 }
 0x6fb   :  { %v716_v3 = vmul.f32 %v2042_v12, %v697_v8  ;;  %v708_v59 = vsel %vm707_vm11, %v2040_v53, %v704_v63  ;;  %vm721_vm13 = vweird.f32 %v2042_v12 }
 0x6fc   :  { %v713_v19 = vsel %vm710_vm12, %v712_v1, %v708_v59  ;;  %vm722_vm15 = vmor %vm720_vm14, %vm721_vm13 }
 0x6fd   :  { %v717_v6 = vsub.f32 1.0, %v716_v3  ;;  %v714_v47 = vmul.f32 %v2036_v54, %v713_v19 }
 0x6ff   :  { %v718_v14 = vmul.f32 %v2042_v12, %v717_v6  ;;  %1891 = vmatmul.msk.f32.vlgmr.msrb.gmra.mxu2 %vm312_vm1, %v714_v47 }
 0x701   :  { %v719_v2 = vadd.f32 %v2042_v12, %v718_v14 }
 0x703   :  { %v723_v46 = vsel %vm722_vm15, %v2042_v12, %v719_v2  ;;  %v2691_v12 = vperm.slane %v2318_v21, 5  ;;  %v2716_v2 = vld [vmem:[#allocation7 + $0xa8] sm:$0xff] }
 0x704   :  { %v728_v10 = vsel %vm725_vm2, %v727_v18, %v723_v46  ;;  %v2719_v18 = vld [vmem:[#allocation7 + $0xa0] sm:$0xff]  ;;  %934 = vmatpush.msrb.mxu1 %v2716_v2 }
 0x705   :  { %v729_v62 = vmul.f32 %v2038_v58, %v728_v10 }
 0x706   :  { %935 = vmatpush.msrb.mxu1 %v2719_v18 }
 0x707   :  { %1892 = vmatmul.msk.f32.gmra.mxu2 %vm312_vm1, %v729_v62 }
 0x708   :  { %1207 = vmatpush.msra.mxu1 %v2414_v15 }
 0x70a   :  { %1208 = vmatpush.msra.mxu1 %v2416_v24 }
 0x70c   :  { %1209 = vmatpush.msra.mxu1 %v2425_v39 }
 0x70e   :  { %1210 = vmatpush.msra.mxu1 %v2428_v41 }
 0x710   :  { %1211 = vmatpush.msra.mxu1 %v2431_v42 }
 0x712   :  { %1212 = vmatpush.msra.mxu1 %v2433_v43  ;;  %v2733_v43 = vld [vmem:[#allocation7 + $0xf8] sm:$0xff] }
 0x713   :  { %968 = vmatpush.msra.mxu2 %v2733_v43 }
 0x714   :  { %1213 = vmatpush.msra.mxu1 %v2437_v44 }
 0x716   :  { %1214 = vmatpush.msra.mxu1 %v2440_v45  ;;  %v2738_v45 = vld [vmem:[#allocation7 + $0xe8] sm:$0xff] }
 0x782   :  { %v785_v63 = vpop.f32.mrf.mxu2 }
 0x783   :  { %1893 = vmatmul.msk.f32.vlgmr.msra.gmra.mxu3 %vm73_vm0, %v785_v63 }
 0x784   :  { %1331 = vmatpush.msra.mxu3 %v2465_v33 }
 0x786   :  { %1332 = vmatpush.msra.mxu3 %v2469_v26 }
 0x788   :  { %1333 = vmatpush.msra.mxu3 %v2478_v49 }
 0x78a   :  { %v788_v59 = vpop.f32.mrf.mxu2  ;;  %1334 = vmatpush.msra.mxu3 %v2480_v52 }
 0x78b   :  { %1894 = vmatmul.msk.f32.gmra.mxu3 %vm73_vm0, %v788_v59 }
 0x806   :  { %v819_v32 = vpop.f32.mrf.mxu3 }
 0x807   :  { %v820_v54 = vadd.f32 %v819_v32, %v2691_v12 }
 0x809   :  { %v825_v58 = vadd.f32 %v820_v54, %v2610_v38 }
 0x80b   :  { %v827_v8 = vsel %vm73_vm0, %v825_v58, 0.0 }
 0x80c   :  { %828 = vadd.xlane.f32.xlu2 %v827_v8 }
 0x80e   :  { %v822_v33 = vpop.f32.mrf.mxu3 }
 0x80f   :  { %v823_v26 = vadd.f32 %v822_v33, %v2691_v12 }
 0x811   :  { %v826_v49 = vadd.f32 %v823_v26, %v2617_v31 }
 0x813   :  { %v830_v52 = vsel %vm73_vm0, %v826_v49, 0.0 }
 0x814   :  { %831 = vadd.xlane.f32.xlu0 %v830_v52 }
 0x87f   :  { %v829_v14 = vpop.xlane.xlu2 %828 }
 0x880   :  { %v833_v21 = vmul.f32 %v829_v14, %v2553_v11 }
 0x882   :  { %v2700_v47 = vsub.f32 %v825_v58, %v833_v21 }
 0x884   :  { %v837_v6 = vmul.f32 %v2700_v47, %v2700_v47 }
 0x886   :  { %v839_v38 = vsel %vm73_vm0, %v837_v6, 0.0  ;;  %v2735_v6 = vld [vmem:[#allocation7 + $0xf0] sm:$0xff] }
 0x887   :  { %840 = vadd.xlane.f32.xlu1 %v839_v38  ;;  %v832_v19 = vpop.xlane.xlu0 %831  ;;  %969 = vmatpush.msra.mxu2 %v2735_v6 }
 0x888   :  { %v834_v53 = vmul.f32 %v832_v19, %v2553_v11  ;;  %v2741_v19 = vld [vmem:[#allocation7 + $0xe0] sm:$0xff] }
 0x889   :  { %970 = vmatpush.msra.mxu2 %v2738_v45 }
 0x88a   :  { %v2706_v1 = vsub.f32 %v826_v49, %v834_v53 }
 0x88b   :  { %971 = vmatpush.msra.mxu2 %v2741_v19 }
 0x88c   :  { %v838_v31 = vmul.f32 %v2706_v1, %v2706_v1 }
 0x88e   :  { %v842_v3 = vsel %vm73_vm0, %v838_v31, 0.0 }
 0x88f   :  { %843 = vadd.xlane.f32.xlu2 %v842_v3  ;;  %v2744_v3 = vld [vmem:[#allocation7 + $0xd8] sm:$0xff] }
 0x890   :  { %972 = vmatpush.msra.mxu2 %v2744_v3 }
 0x8fa   :  { %v841_v46 = vpop.xlane.xlu1 %840 }
 0x8fb   :  { %v845_v10 = vmul.f32 %v841_v46, %v2553_v11 }
 0x8fd   :  { %v847_v62 = vadd.f32 1e-05, %v845_v10 }
 0x8ff   :  { %2043 = vrsqrt.f32 %v847_v62  ;;  %vm856_vm3 = vcmp.eq.f32.partialorder %v847_v62, inf  ;;  %v859_v42 = vand.u32 2147483648, %v847_v62  ;;  %vm858_vm4 = vcmp.eq.f32.partialorder %v847_v62, 0.0 }
 0x902   :  { %v844_v63 = vpop.xlane.xlu2 %843 }
 0x903   :  { %v846_v59 = vmul.f32 %v844_v63, %v2553_v11 }
 0x905   :  { %v2044_v32 = vpop.eup %2043  ;;  %v848_v54 = vadd.f32 1e-05, %v846_v59  ;;  %v2747_v59 = vld [vmem:[#allocation7 + $0xd0] sm:$0xff] }
 0x906   :  { %v850_v58 = vmul.f32 %v2044_v32, %v847_v62  ;;  %973 = vmatpush.msra.mxu2 %v2747_v59 }
 0x907   :  { %2045 = vrsqrt.f32 %v848_v54  ;;  %vm868_vm5 = vcmp.eq.f32.partialorder %v848_v54, inf  ;;  %v871_v31 = vand.u32 2147483648, %v848_v54  ;;  %vm870_vm6 = vcmp.eq.f32.partialorder %v848_v54, 0.0 }
 0x908   :  { %v851_v15 = vmul.f32 %v2044_v32, %v850_v58 }
 0x90a   :  { %v852_v24 = vmul.f32 0.5, %v851_v15 }
 0x90c   :  { %v853_v39 = vsub.f32 1.5, %v852_v24 }
 0x90d   :  { %v2046_v8 = vpop.eup %2045 }
 0x90e   :  { %v854_v33 = vmul.f32 %v2044_v32, %v853_v39  ;;  %v862_v41 = vmul.f32 %v2046_v8, %v848_v54 }
 0x910   :  { %v855_v26 = vmul.f32 %v854_v33, %v847_v62  ;;  %v863_v49 = vmul.f32 %v2046_v8, %v862_v41  ;;  %v2752_v41 = vperm.slane %v2599_v30, 1 }
 0x912   :  { %v857_v52 = vsel %vm856_vm3, %v847_v62, %v855_v26  ;;  %v864_v14 = vmul.f32 0.5, %v863_v49 }
 0x913   :  { %v860_v21 = vsel %vm858_vm4, %v859_v42, %v857_v52  ;;  %v2756_v52 = vperm.slane %v2599_v30, 2 }
 0x914   :  { %v865_v44 = vsub.f32 1.5, %v864_v14  ;;  %2047 = vrcp.f32 %v860_v21  ;;  %v884_v58 = vand.u32 2147483648, %v860_v21  ;;  %v882_v24 = vand.u32 2147483647, %v860_v21 }
 0x915   :  { %vm878_vm8 = vweird.f32 %v860_v21 }
 0x916   :  { %v866_v38 = vmul.f32 %v2046_v8, %v865_v44  ;;  %vm883_vm10 = vcmp.eq.f32.partialorder %v882_v24, 8.507059e+37  ;;  %v2772_v24 = vld [vmem:[#allocation7 + $0xc0] sm:$0xff] }
 0x918   :  { %v867_v53 = vmul.f32 %v866_v38, %v848_v54 }
 0x91a   :  { %v2048_v46 = vpop.eup %2047  ;;  %v869_v10 = vsel %vm868_vm5, %v848_v54, %v867_v53  ;;  %v885_v54 = vor.u32 1.1754944e-38, %v884_v58 }
 0x91b   :  { %v874_v62 = vmul.f32 %v2048_v46, %v860_v21  ;;  %v872_v63 = vsel %vm870_vm6, %v871_v31, %v869_v10  ;;  %vm879_vm7 = vweird.f32 %v2048_v46 }
 0x91c   :  { %2049 = vrcp.f32 %v872_v63  ;;  %vm880_vm9 = vmor %vm878_vm8, %vm879_vm7  ;;  %v899_v44 = vand.u32 2147483648, %v872_v63  ;;  %v897_v53 = vand.u32 2147483647, %v872_v63  ;;  %vm893_vm12 = vweird.f32 %v872_v63 }
 0x91d   :  { %v875_v32 = vsub.f32 1.0, %v874_v62 }
 0x91e   :  { %v900_v10 = vor.u32 1.1754944e-38, %v899_v44  ;;  %vm898_vm14 = vcmp.eq.f32.partialorder %v897_v53, 8.507059e+37 }
 0x91f   :  { %v876_v15 = vmul.f32 %v2048_v46, %v875_v32 }
 0x921   :  { %v877_v39 = vadd.f32 %v2048_v46, %v876_v15 }
 0x922   :  { %v2050_v8 = vpop.eup %2049 }
 0x923   :  { %v881_v33 = vsel %vm880_vm9, %v2048_v46, %v877_v39  ;;  %v889_v26 = vmul.f32 %v2050_v8, %v872_v63  ;;  %vm894_vm11 = vweird.f32 %v2050_v8  ;;  %v2769_v63 = vld [vmem:[#allocation7 + $0xc8] sm:$0xff] }
 0x924   :  { %v886_v49 = vsel %vm883_vm10, %v885_v54, %v881_v33  ;;  %vm895_vm13 = vmor %vm893_vm12, %vm894_vm11  ;;  %974 = vmatpush.msra.mxu2 %v2769_v63 }
 0x925   :  { %v887_v42 = vmul.f32 %v886_v49, %v2700_v47  ;;  %v890_v14 = vsub.f32 1.0, %v889_v26 }
 0x926   :  { %975 = vmatpush.msra.mxu2 %v2772_v24 }
 0x927   :  { %v904_v38 = vmul.f32 %v2752_v41, %v887_v42  ;;  %v891_v21 = vmul.f32 %v2050_v8, %v890_v14 }
 0x929   :  { %v907_v31 = vadd.f32 %v2756_v52, %v904_v38  ;;  %v892_v46 = vadd.f32 %v2050_v8, %v891_v21 }
 0x92b   :  { %1895 = vmatmul.msk.f32.vlgmr.msrb.gmra.mxu1 %vm73_vm0, %v907_v31  ;;  %v896_v62 = vsel %vm895_vm13, %v2050_v8, %v892_v46 }
 0x92c   :  { %v901_v47 = vsel %vm898_vm14, %v900_v10, %v896_v62  ;;  %1442 = vmatpush.msrb.mxu1 %v2577_v27  ;;  %v2099_v27 = vld [vmem:[#allocation7 + $0x100] sm:$0xff] }
 0x92d   :  { %v902_v32 = vmul.f32 %v901_v47, %v2706_v1  ;;  %v2781_v33 = vperm.slane %v2099_v27, 6 }
 0x92e   :  { %1443 = vmatpush.msrb.mxu1 %v2581_v16  ;;  %v2775_v16 = vperm.slane %v2099_v27, 2 }
 0x92f   :  { %v905_v58 = vmul.f32 %v2752_v41, %v902_v32 }
 0x930   :  { %1444 = vmatpush.msrb.mxu1 %v2583_v34 }
 0x931   :  { %v908_v15 = vadd.f32 %v2756_v52, %v905_v58 }
 0x932   :  { %1445 = vmatpush.msrb.mxu1 %v2586_v4 }
 0x933   :  { %1896 = vmatmul.msk.f32.gmra.mxu1 %vm73_vm0, %v908_v15 }
 0x9a8   :  { %v937_v1 = vpop.f32.mrf.mxu1 }
 0x9a9   :  { %v938_v34 = vadd.f32 %v937_v1, %v2775_v16 }
 0x9ab   :  { %v943_v39 = vmax.f32 %v938_v34, 0.0 }
 0x9ad   :  { %1897 = vmatmul.msk.f32.vlgmr.msra.gmra.mxu2 %vm312_vm1, %v943_v39 }
 0x9b0   :  { %v940_v4 = vpop.f32.mrf.mxu1 }
 0x9b1   :  { %v941_v8 = vadd.f32 %v940_v4, %v2775_v16 }
 0x9b3   :  { %v944_v54 = vmax.f32 %v941_v8, 0.0 }
 0x9b5   :  { %1898 = vmatmul.msk.f32.gmra.mxu2 %vm312_vm1, %v944_v54 }
 0xa30   :  { %v977_v26 = vpop.f32.mrf.mxu2 }
 0xa31   :  { %v978_v49 = vadd.f32 %v977_v26, %v2781_v33 }
 0xa33   :  { %v983_v42 = vadd.f32 %v978_v49, %v907_v31 }
 0xa35   :  { %v985_v14 = vsel %vm73_vm0, %v983_v42, 0.0 }
 0xa36   :  { %986 = vadd.xlane.f32.xlu0 %v985_v14 }
 0xa38   :  { %v980_v44 = vpop.f32.mrf.mxu2 }
 0xa39   :  { %v981_v38 = vadd.f32 %v980_v44, %v2781_v33 }
 0xa3b   :  { %v984_v21 = vadd.f32 %v981_v38, %v908_v15 }
 0xa3d   :  { %v988_v53 = vsel %vm73_vm0, %v984_v21, 0.0 }
 0xa3e   :  { %989 = vadd.xlane.f32.xlu1 %v988_v53 }
 0xaa9   :  { %v987_v46 = vpop.xlane.xlu0 %986 }
 0xaaa   :  { %v991_v10 = vmul.f32 %v987_v46, %v2553_v11 }
 0xaac   :  { %v993_v62 = vsub.f32 %v983_v42, %v991_v10 }
 0xaae   :  { %v995_v47 = vmul.f32 %v993_v62, %v993_v62 }
 0xab0   :  { %v997_v32 = vsel %vm73_vm0, %v995_v47, 0.0 }
 0xab1   :  { %v990_v58 = vpop.xlane.xlu1 %989  ;;  %998 = vadd.xlane.f32.xlu2 %v997_v32 }
 0xab2   :  { %v992_v31 = vmul.f32 %v990_v58, %v2553_v11 }
 0xab4   :  { %v2790_v27 = vsub.f32 %v984_v21, %v992_v31 }
 0xab6   :  { %v996_v1 = vmul.f32 %v2790_v27, %v2790_v27 }
 0xab8   :  { %v1000_v15 = vsel %vm73_vm0, %v996_v1, 0.0 }
 0xab9   :  { %1001 = vadd.xlane.f32.xlu0 %v1000_v15 }
 0xb24   :  { %v999_v34 = vpop.xlane.xlu2 %998 }
 0xb25   :  { %v1003_v39 = vmul.f32 %v999_v34, %v2553_v11 }
 0xb27   :  { %v1005_v4 = vadd.f32 1e-05, %v1003_v39 }
 0xb29   :  { %2051 = vrsqrt.f32 %v1005_v4  ;;  %vm1014_vm15 = vcmp.eq.f32.partialorder %v1005_v4, inf  ;;  %v1017_v32 = vand.u32 2147483648, %v1005_v4  ;;  %vm1016_vm2 = vcmp.eq.f32.partialorder %v1005_v4, 0.0 }
 0xb2c   :  { %v1002_v8 = vpop.xlane.xlu0 %1001 }
 0xb2d   :  { %v1004_v54 = vmul.f32 %v1002_v8, %v2553_v11 }
 0xb2f   :  { %v2052_v26 = vpop.eup %2051  ;;  %v1006_v49 = vadd.f32 1e-05, %v1004_v54 }
 0xb30   :  { %v1008_v42 = vmul.f32 %v2052_v26, %v1005_v4 }
 0xb31   :  { %2053 = vrsqrt.f32 %v1006_v49  ;;  %vm1026_vm3 = vcmp.eq.f32.partialorder %v1006_v49, inf  ;;  %v1029_v8 = vand.u32 2147483648, %v1006_v49  ;;  %vm1028_vm4 = vcmp.eq.f32.partialorder %v1006_v49, 0.0 }
 0xb32   :  { %v1009_v14 = vmul.f32 %v2052_v26, %v1008_v42 }
 0xb34   :  { %v1010_v44 = vmul.f32 0.5, %v1009_v14 }
 0xb36   :  { %v1011_v38 = vsub.f32 1.5, %v1010_v44 }
 0xb37   :  { %v2054_v21 = vpop.eup %2053 }
 0xb38   :  { %v1012_v53 = vmul.f32 %v2052_v26, %v1011_v38  ;;  %v1020_v46 = vmul.f32 %v2054_v21, %v1006_v49 }
 0xb3a   :  { %v1013_v10 = vmul.f32 %v1012_v53, %v1005_v4  ;;  %v1021_v47 = vmul.f32 %v2054_v21, %v1020_v46 }
 0xb3c   :  { %v1015_v58 = vsel %vm1014_vm15, %v1005_v4, %v1013_v10  ;;  %v1022_v31 = vmul.f32 0.5, %v1021_v47 }
 0xb3d   :  { %v1018_v1 = vsel %vm1016_vm2, %v1017_v32, %v1015_v58  ;;  %v2798_v32 = vperm.slane %v2599_v30, 3 }
 0xb3e   :  { %v1023_v15 = vsub.f32 1.5, %v1022_v31  ;;  %2055 = vrcp.f32 %v1018_v1  ;;  %v1042_v38 = vand.u32 2147483648, %v1018_v1  ;;  %v1040_v46 = vand.u32 2147483647, %v1018_v1 }
 0xb3f   :  { %vm1036_vm6 = vweird.f32 %v1018_v1 }
 0xb40   :  { %v1024_v34 = vmul.f32 %v2054_v21, %v1023_v15  ;;  %v1043_v47 = vor.u32 1.1754944e-38, %v1042_v38  ;;  %vm1041_vm8 = vcmp.eq.f32.partialorder %v1040_v46, 8.507059e+37  ;;  %v2801_v15 = vperm.slane %v2599_v30, 4  ;;  %v2100_v38 = vld [vmem:[#allocation7 + $0x1a8] sm:$0xff]  ;;  %v2101_v46 = vld [vmem:[#allocation7 + $0x1a0] sm:$0xff] }
 0xb42   :  { %v1025_v39 = vmul.f32 %v1024_v34, %v1006_v49 }
 0xb44   :  { %v2056_v54 = vpop.eup %2055  ;;  %v1027_v42 = vsel %vm1026_vm3, %v1006_v49, %v1025_v39 }
 0xb45   :  { %v1032_v14 = vmul.f32 %v2056_v54, %v1018_v1  ;;  %v1030_v26 = vsel %vm1028_vm4, %v1029_v8, %v1027_v42  ;;  %vm1037_vm5 = vweird.f32 %v2056_v54 }
 0xb46   :  { %2057 = vrcp.f32 %v1030_v26  ;;  %vm1038_vm7 = vmor %vm1036_vm6, %vm1037_vm5  ;;  %v1057_v39 = vand.u32 2147483648, %v1030_v26  ;;  %v1055_v1 = vand.u32 2147483647, %v1030_v26  ;;  %vm1051_vm10 = vweird.f32 %v1030_v26 }
 0xb47   :  { %v1033_v44 = vsub.f32 1.0, %v1032_v14 }
 0xb48   :  { %vm1056_vm12 = vcmp.eq.f32.partialorder %v1055_v1, 8.507059e+37 }
 0xb49   :  { %v1034_v53 = vmul.f32 %v2056_v54, %v1033_v44  ;;  %v1058_v44 = vor.u32 1.1754944e-38, %v1057_v39 }
 0xb4b   :  { %v1035_v4 = vadd.f32 %v2056_v54, %v1034_v53 }
 0xb4c   :  { %v2058_v10 = vpop.eup %2057 }
 0xb4d   :  { %v1039_v21 = vsel %vm1038_vm7, %v2056_v54, %v1035_v4  ;;  %v1047_v58 = vmul.f32 %v2058_v10, %v1030_v26  ;;  %vm1052_vm9 = vweird.f32 %v2058_v10 }
 0xb4e   :  { %v1044_v49 = vsel %vm1041_vm8, %v1043_v47, %v1039_v21  ;;  %vm1053_vm11 = vmor %vm1051_vm10, %vm1052_vm9  ;;  %v2102_v47 = vld [vmem:[#allocation7 + $0x198] sm:$0xff]  ;;  %v2103_v21 = vld [vmem:[#allocation7 + $0x190] sm:$0xff] }
 0xb4f   :  { %v1045_v31 = vmul.f32 %v1044_v49, %v993_v62  ;;  %v1048_v34 = vsub.f32 1.0, %v1047_v58  ;;  %v2105_v58 = vld [vmem:[#allocation7 + $0x180] sm:$0xff]  ;;  %v2106_v49 = vld [vmem:[#allocation7 + $0x178] sm:$0xff] }
 0xb51   :  { %v1062_v8 = vmul.f32 %v2798_v32, %v1045_v31  ;;  %v1049_v42 = vmul.f32 %v2058_v10, %v1048_v34 }
 0xb53   :  { %v2805_v14 = vadd.f32 %v2801_v15, %v1062_v8  ;;  %v1050_v54 = vadd.f32 %v2058_v10, %v1049_v42 }
 0xb55   :  { %1899 = vmatmul.msk.f32.vlgmr.msrb.gmra.mxu3 %vm73_vm0, %v2805_v14  ;;  %v1054_v62 = vsel %vm1053_vm11, %v2058_v10, %v1050_v54  ;;  %v2104_v10 = vld [vmem:[#allocation7 + $0x188] sm:$0xff] }
 0xb56   :  { %v1059_v30 = vsel %vm1056_vm12, %v1058_v44, %v1054_v62  ;;  %1508 = vmatpush.msrb.mxu3 %v2100_v38 }
 0xb57   :  { %v1060_v53 = vmul.f32 %v1059_v30, %v2790_v27  ;;  %v2107_v27 = vld [vmem:[#allocation7 + $0x170] sm:$0xff] }
 0xb58   :  { %1509 = vmatpush.msrb.mxu3 %v2101_v46 }
 0xb59   :  { %v1063_v4 = vmul.f32 %v2798_v32, %v1060_v53 }
 0xb5a   :  { %1510 = vmatpush.msrb.mxu3 %v2102_v47 }
 0xb5b   :  { %v2812_v26 = vadd.f32 %v2801_v15, %v1063_v4 }
 0xb5c   :  { %1511 = vmatpush.msrb.mxu3 %v2103_v21 }
 0xb5d   :  { %1900 = vmatmul.msk.f32.gmra.mxu3 %vm73_vm0, %v2812_v26 }
 0xb5e   :  { %1512 = vmatpush.msrb.mxu3 %v2104_v10 }
 0xb60   :  { %1513 = vmatpush.msrb.mxu3 %v2105_v58 }
 0xb62   :  { %1514 = vmatpush.msrb.mxu3 %v2106_v49 }
 0xb64   :  { %1515 = vmatpush.msrb.mxu3 %v2107_v27 }
 0xbd8   :  { %v1090_v31 = vpop.f32.mrf.mxu3 }
 0xbd9   :  { %v2817_v34 = vadd.f32 %v1090_v31, %v2323_v23 }
 0xbdb   :  { %v1102_v39 = vmul.f32 %v2817_v34, %v2325_v25  ;;  %v1100_v25 = vmul.f32 %v2817_v34, %v2335_v29 }
 0xbdd   :  { %1132 = vrot.lane.b32.xlu2 %v1102_v39, %s2220_s27 }
 0xbe0   :  { %v1093_v8 = vpop.f32.mrf.mxu3 }
 0xbe1   :  { %v2823_v42 = vadd.f32 %v1093_v8, %v2323_v23  ;;  %v1098_v23 = vmul.f32 %v2817_v34, %v2349_v35 }
 0xbe3   :  { %v1103_v1 = vmul.f32 %v2823_v42, %v2316_v20  ;;  %v1101_v54 = vmul.f32 %v2823_v42, %v2320_v22  ;;  %v1099_v44 = vmul.f32 %v2823_v42, %v2333_v28  ;;  %v1096_v20 = vmul.f32 %v2817_v34, %v2351_v36 }
 0xbe4   :  { %v1111_v22 = vmul.f32 %v2823_v42, %v2385_v50  ;;  %v1110_v28 = vmul.f32 %v2817_v34, %v2391_v51  ;;  %v1097_v29 = vmul.f32 %v2823_v42, %v2362_v40  ;;  %v1109_v35 = vmul.f32 %v2823_v42, %v2400_v55 }
 0xbe5   :  { %1134 = vrot.lane.b32.xlu1 %v1103_v1, %s2220_s27  ;;  %1130 = vrot.lane.b32.xlu0 %v1101_v54, %s2220_s27  ;;  %v1108_v36 = vmul.f32 %v2817_v34, %v2402_v56  ;;  %v1107_v50 = vmul.f32 %v2823_v42, %v2409_v60  ;;  %v1106_v40 = vmul.f32 %v2817_v34, %v2447_v57 }
 0xbe6   :  { %1126 = vrot.lane.b32.xlu2 %v1099_v44, %s2220_s27  ;;  %v1997_v62 = vpack.i.bf16 %v1110_v28, %v1111_v22  ;;  %v1105_v38 = vmul.f32 %v2823_v42, %v2458_v0  ;;  %v1104_v55 = vmul.f32 %v2817_v34, %v2411_v61  ;;  %v3086_v22 = vld [vmem:[#allocation12_spill] sm:$0xff] }
 0xbe7   :  { %v2002_v30 = vpack.i.bf16 %v1108_v36, %v1109_v35  ;;  %v2007_v51 = vpack.i.bf16 %v1106_v40, %v1107_v50  ;;  %v3092_v35 = vunpack.i.l.bf16 %v2650_v17  ;;  %v3094_v36 = vld [vmem:[#allocation15_spill] sm:$0xff]  ;;  %v3097_v50 = vld [vmem:[#allocation16_spill] sm:$0xff] }
 0xbe8   :  { %v2012_v53 = vpack.i.bf16 %v1104_v55, %v1105_v38  ;;  %v2109_v55 = vld [vmem:[#allocation7 + $0x158] sm:$0xff] }
 0xbed   :  { %1128 = vrot.lane.b32.xlu1 %v1100_v25, %s2220_s27  ;;  %1124 = vrot.lane.b32.xlu0 %v1098_v23, %s2220_s27  ;;  %v3084_v23 = vld [vmem:[#allocation19_spill] sm:$0xff] }
 0xbee   :  { %1120 = vrot.lane.b32.xlu2 %v1096_v20, %s2220_s27  ;;  %v3085_v20 = vunpack.i.l.bf16 %v3084_v23  ;;  %v3087_v28 = vunpack.i.h.bf16 %v3084_v23 }
 0xbf5   :  { %1122 = vrot.lane.b32.xlu1 %v1097_v29, %s2220_s27  ;;  %v3089_v29 = vunpack.i.l.bf16 %v2640_v37 }
 0xbf6   :  { %1998 = vrot.lane.b32.xlu2 %v1997_v62, %s2221_s28  ;;  %v3091_v62 = vld [vmem:[#allocation14_spill] sm:$0xff] }
 0xbfe   :  { %2003 = vrot.lane.b32.xlu2 %v2002_v30, %s2221_s28  ;;  %v3095_v30 = vunpack.i.l.bf16 %v2653_v13 }
 0xc06   :  { %2008 = vrot.lane.b32.xlu2 %v2007_v51, %s2221_s28 }
 0xc0e   :  { %2013 = vrot.lane.b32.xlu2 %v2012_v53, %s2221_s28 }
 0xc37   :  { %v1133_v56 = vpop.permute.xlu2 %1132 }
 0xc40   :  { %v1127_v46 = vpop.permute.xlu2 %1126 }
 0xc48   :  { %v1121_v4 = vpop.permute.xlu2 %1120 }
 0xc50   :  { %v1999_v47 = vpop.permute.xlu2 %1998 }
 0xc51   :  { %v2000_v60 = vunpack.i.l.bf16 %v1999_v47  ;;  %v2001_v21 = vunpack.i.h.bf16 %v1999_v47 }
 0xc53   :  { %1298 = vmatpush.msrb.mxu2 %v2000_v60 }
 0xc55   :  { %1299 = vmatpush.msrb.mxu2 %v2001_v21 }
 0xc57   :  { %v1135_v57 = vpop.permute.xlu1 %1134  ;;  %v1131_v61 = vpop.permute.xlu0 %1130 }
 0xc58   :  { %v2004_v10 = vpop.permute.xlu2 %2003  ;;  %1901 = vmatpush.xpose.msk.msrb.mxu0 %vm73_vm0, %v1135_v57 }
 0xc59   :  { %v2005_v58 = vunpack.i.l.bf16 %v2004_v10  ;;  %v2006_v0 = vunpack.i.h.bf16 %v2004_v10 }
 0xc5b   :  { %1300 = vmatpush.msrb.mxu2 %v2005_v58  ;;  %v3099_v58 = vld [vmem:[#allocation23_spill] sm:$0xff] }
 0xc5c   :  { %1902 = vmatpush.xpose.msk.msrb.mxu0 %vm73_vm0, %v1133_v56 }
 0xc5d   :  { %1301 = vmatpush.msrb.mxu2 %v2006_v0  ;;  %v3100_v0 = vld [vmem:[#allocation24_spill] sm:$0xff] }
 0xc5f   :  { %v1129_v31 = vpop.permute.xlu1 %1128  ;;  %v1125_v54 = vpop.permute.xlu0 %1124 }
 0xc60   :  { %v2009_v49 = vpop.permute.xlu2 %2008  ;;  %1903 = vmatpush.xpose.msk.msrb.mxu0 %vm73_vm0, %v1131_v61  ;;  %v3101_v61 = vld [vmem:[#allocation25_spill] sm:$0xff] }
 0xc61   :  { %v2010_v27 = vunpack.i.l.bf16 %v2009_v49  ;;  %v2011_v39 = vunpack.i.h.bf16 %v2009_v49 }
 0xc63   :  { %1302 = vmatpush.msrb.mxu2 %v2010_v27  ;;  %v3102_v27 = vld [vmem:[#allocation26_spill] sm:$0xff] }
 0xc64   :  { %1904 = vmatpush.xpose.msk.msrb.mxu0 %vm73_vm0, %v1129_v31 }
 0xc65   :  { %1303 = vmatpush.msrb.mxu2 %v2011_v39 }
 0xc67   :  { %v1123_v25 = vpop.permute.xlu1 %1122 }
 0xc68   :  { %v2014_v8 = vpop.permute.xlu2 %2013  ;;  %1905 = vmatpush.xpose.msk.msrb.mxu0 %vm73_vm0, %v1127_v46 }
 0xc69   :  { %v2015_v1 = vunpack.i.l.bf16 %v2014_v8  ;;  %v2016_v44 = vunpack.i.h.bf16 %v2014_v8 }
 0xc6b   :  { %1304 = vmatpush.msrb.mxu2 %v2015_v1 }
 0xc6c   :  { %1906 = vmatpush.xpose.msk.msrb.mxu0 %vm73_vm0, %v1125_v54 }
 0xc6d   :  { %1305 = vmatpush.msrb.mxu2 %v2016_v44 }
 0xc6f   :  { %1919 = vmatpush.xpose.msk.msra.mxu2 %vm73_vm0, %v2476_v48  ;;  %v3088_v48 = vld [vmem:[#allocation13_spill] sm:$0xff] }
 0xc70   :  { %1907 = vmatpush.xpose.msk.msrb.mxu0 %vm73_vm0, %v1123_v25 }
 0xc73   :  { %1920 = vmatpush.xpose.msk.msra.mxu2 %vm73_vm0, %v2490_v7  ;;  %v3090_v7 = vunpack.i.h.bf16 %v2640_v37  ;;  %v3096_v37 = vunpack.i.h.bf16 %v2653_v13 }
 0xc74   :  { %1908 = vmatpush.xpose.msk.msrb.mxu0 %vm73_vm0, %v1121_v4 }
 0xc77   :  { %1921 = vmatpush.xpose.msk.msra.mxu2 %vm73_vm0, %v3086_v22  ;;  %1909 = vmatmul.msk.f32.vlgmr.msrb.gmra.mxu0 %vm73_vm0, %v2817_v34  ;;  %v3093_v34 = vunpack.i.h.bf16 %v2650_v17  ;;  %v3098_v17 = vld [vmem:[#allocation17_spill] sm:$0xff] }
 0xc78   :  { %1567 = vmatpush.msra.mxu0 %v3085_v20 }
 0xc7a   :  { %1568 = vmatpush.msra.mxu0 %v3087_v28 }
 0xc7b   :  { %1922 = vmatpush.xpose.msk.msra.mxu2 %vm73_vm0, %v3088_v48 }
 0xc7c   :  { %1569 = vmatpush.msra.mxu0 %v3089_v29 }
 0xc7e   :  { %1570 = vmatpush.msra.mxu0 %v3090_v7 }
 0xc7f   :  { %1923 = vmatpush.xpose.msk.msra.mxu2 %vm73_vm0, %v3091_v62  ;;  %1910 = vmatmul.msk.f32.gmra.mxu0 %vm73_vm0, %v2823_v42  ;;  %v2108_v42 = vld [vmem:[#allocation7 + $0x150] sm:$0xff] }
 0xc80   :  { %1571 = vmatpush.msra.mxu0 %v3092_v35 }
 0xc82   :  { %1572 = vmatpush.msra.mxu0 %v3093_v34 }
 0xc83   :  { %1924 = vmatpush.xpose.msk.msra.mxu2 %vm73_vm0, %v3094_v36 }
 0xc84   :  { %1573 = vmatpush.msra.mxu0 %v3095_v30 }
 0xc86   :  { %1574 = vmatpush.msra.mxu0 %v3096_v37 }
 0xc87   :  { %1925 = vmatpush.xpose.msk.msra.mxu2 %vm73_vm0, %v3097_v50 }
 0xc88   :  { %1738 = vmatpush.msrb.mxu0 %v2733_v43 }
 0xc8a   :  { %1739 = vmatpush.msrb.mxu0 %v2735_v6 }
 0xc8b   :  { %1926 = vmatpush.xpose.msk.msra.mxu2 %vm73_vm0, %v3098_v17 }
 0xc8c   :  { %1740 = vmatpush.msrb.mxu0 %v2738_v45 }
 0xc8e   :  { %1741 = vmatpush.msrb.mxu0 %v2741_v19 }
 0xc90   :  { %1742 = vmatpush.msrb.mxu0 %v2744_v3 }
 0xc92   :  { %1743 = vmatpush.msrb.mxu0 %v2747_v59 }
 0xc94   :  { %1744 = vmatpush.msrb.mxu0 %v2769_v63 }
 0xc96   :  { %1745 = vmatpush.msrb.mxu0 %v2772_v24 }
 0xcf4   :  { %v1175_v13 = vpop.f32.mrf.mxu0 }
 0xcf5   :  { %v1176_v40 = vadd.f32 %v2108_v42, %v1175_v13 }
 0xcf7   :  { %v1181_v51 = vsel %vm312_vm1, %v1176_v40, -inf }
 0xcf8   :  { %1182 = vmax.xlane.f32.xlu0 %v1181_v51 }
 0xcfc   :  { %v1178_v38 = vpop.f32.mrf.mxu0 }
 0xcfd   :  { %v1179_v53 = vadd.f32 %v2109_v55, %v1178_v38  ;;  %v3103_v55 = vld [vmem:[#allocation18_spill] sm:$0xff] }
 0xcff   :  { %v1184_v56 = vsel %vm312_vm1, %v1179_v53, -inf }
 0xd00   :  { %1185 = vmax.xlane.f32.xlu1 %v1184_v56 }
 0xd6b   :  { %v1183_v46 = vpop.xlane.xlu0 %1182 }
 0xd6c   :  { %v1187_v4 = vsub.f32 %v1176_v40, %v1183_v46 }
 0xd6e   :  { %v1189_v47 = vmul.f32 1.442695, %v1187_v4 }
 0xd70   :  { %2059 = vpow2.f32 %v1189_v47 }
 0xd73   :  { %v1186_v60 = vpop.xlane.xlu1 %1185 }
 0xd74   :  { %v1188_v21 = vsub.f32 %v1179_v53, %v1186_v60 }
 0xd76   :  { %v2060_v57 = vpop.eup %2059  ;;  %v1191_v10 = vmul.f32 1.442695, %v1188_v21 }
 0xd77   :  { %1911 = vmatmul.msk.f32.vlgmr.msra.gmra.mxu1 %vm312_vm1, %v2060_v57 }
 0xd78   :  { %2061 = vpow2.f32 %v1191_v10  ;;  %1600 = vmatpush.msra.mxu1 %v3099_v58 }
 0xd7a   :  { %1601 = vmatpush.msra.mxu1 %v3100_v0 }
 0xd7c   :  { %1602 = vmatpush.msra.mxu1 %v3101_v61 }
 0xd7e   :  { %v2062_v49 = vpop.eup %2061  ;;  %1603 = vmatpush.msra.mxu1 %v3102_v27 }
 0xd7f   :  { %1912 = vmatmul.msk.f32.gmra.mxu1 %vm312_vm1, %v2062_v49 }
 0xdf4   :  { %v1216_v31 = vpop.f32.mrf.mxu1 }
 0xdf5   :  { %2063 = vrcp.f32 %v1216_v31  ;;  %v1233_v44 = vand.u32 2147483648, %v1216_v31  ;;  %v1231_v23 = vand.u32 2147483647, %v1216_v31  ;;  %vm1227_vm14 = vweird.f32 %v1216_v31 }
 0xdf7   :  { %v1234_v28 = vor.u32 1.1754944e-38, %v1233_v44  ;;  %vm1232_vm2 = vcmp.eq.f32.partialorder %v1231_v23, 8.507059e+37 }
 0xdfb   :  { %v2064_v39 = vpop.eup %2063 }
 0xdfc   :  { %v1223_v8 = vmul.f32 %v2064_v39, %v1216_v31  ;;  %v1219_v1 = vpop.f32.mrf.mxu1  ;;  %vm1228_vm13 = vweird.f32 %v2064_v39 }
 0xdfd   :  { %2065 = vrcp.f32 %v1219_v1  ;;  %vm1229_vm15 = vmor %vm1227_vm14, %vm1228_vm13  ;;  %v1248_v34 = vand.u32 2147483648, %v1219_v1  ;;  %v1246_v30 = vand.u32 2147483647, %v1219_v1  ;;  %vm1242_vm4 = vweird.f32 %v1219_v1 }
 0xdfe   :  { %v1224_v54 = vsub.f32 1.0, %v1223_v8 }
 0xdff   :  { %v1249_v50 = vor.u32 1.1754944e-38, %v1248_v34  ;;  %vm1247_vm6 = vcmp.eq.f32.partialorder %v1246_v30, 8.507059e+37 }
 0xe00   :  { %v1225_v25 = vmul.f32 %v2064_v39, %v1224_v54 }
 0xe02   :  { %v1226_v20 = vadd.f32 %v2064_v39, %v1225_v25 }
 0xe03   :  { %v2066_v22 = vpop.eup %2065 }
 0xe04   :  { %v1230_v48 = vsel %vm1229_vm15, %v2064_v39, %v1226_v20  ;;  %v1238_v29 = vmul.f32 %v2066_v22, %v1219_v1  ;;  %vm1243_vm3 = vweird.f32 %v2066_v22 }
 0xe05   :  { %v1235_v7 = vsel %vm1232_vm2, %v1234_v28, %v1230_v48  ;;  %vm1244_vm5 = vmor %vm1242_vm4, %vm1243_vm3 }
 0xe06   :  { %v1239_v62 = vsub.f32 1.0, %v1238_v29  ;;  %v1236_v35 = vmul.f32 %v2060_v57, %v1235_v7 }
 0xe08   :  { %v1240_v36 = vmul.f32 %v2066_v22, %v1239_v62  ;;  %1913 = vmatmul.msk.f32.vlgmr.msrb.gmra.mxu2 %vm312_vm1, %v1236_v35 }
 0xe0a   :  { %v1241_v37 = vadd.f32 %v2066_v22, %v1240_v36 }
 0xe0c   :  { %v1245_v17 = vsel %vm1244_vm5, %v2066_v22, %v1241_v37 }
 0xe0d   :  { %v1250_v13 = vsel %vm1247_vm6, %v1249_v50, %v1245_v17 }
 0xe0e   :  { %v1251_v42 = vmul.f32 %v2062_v49, %v1250_v13 }
 0xe10   :  { %1914 = vmatmul.msk.f32.gmra.mxu2 %vm312_vm1, %v1251_v42 }
 0xe8b   :  { %v1307_v40 = vpop.f32.mrf.mxu2 }
 0xe8c   :  { %1915 = vmatmul.msk.f32.vlgmr.msra.gmra.mxu3 %vm73_vm0, %v1307_v40 }
 0xe8d   :  { %1711 = vmatpush.msra.mxu3 %v2711_v5 }
 0xe8f   :  { %1712 = vmatpush.msra.mxu3 %v2713_v9 }
 0xe91   :  { %1713 = vmatpush.msra.mxu3 %v2716_v2 }
 0xe93   :  { %v1310_v51 = vpop.f32.mrf.mxu2  ;;  %1714 = vmatpush.msra.mxu3 %v2719_v18 }
 0xe94   :  { %1916 = vmatmul.msk.f32.gmra.mxu3 %vm73_vm0, %v1310_v51 }
 0xf0f   :  { %v1336_v38 = vpop.f32.mrf.mxu3 }
 0xf10   :  { %v1337_v53 = vadd.f32 %v1336_v38, %v3103_v55 }
 0xf12   :  { %v1342_v56 = vadd.f32 %v1337_v53, %v2805_v14 }
 0xf14   :  { %v1344_v46 = vsel %vm73_vm0, %v1342_v56, 0.0 }
 0xf15   :  { %1345 = vadd.xlane.f32.xlu2 %v1344_v46 }
 0xf17   :  { %v1339_v4 = vpop.f32.mrf.mxu3 }
 0xf18   :  { %v1340_v5 = vadd.f32 %v1339_v4, %v3103_v55 }
 0xf1a   :  { %v1343_v9 = vadd.f32 %v1340_v5, %v2812_v26 }
 0xf1c   :  { %v1347_v2 = vsel %vm73_vm0, %v1343_v9, 0.0 }
 0xf1d   :  { %1348 = vadd.xlane.f32.xlu0 %v1347_v2 }
 0xf88   :  { %v1346_v47 = vpop.xlane.xlu2 %1345 }
 0xf89   :  { %v1350_v18 = vmul.f32 %v1346_v47, %v2553_v11 }
 0xf8b   :  { %v1352_v60 = vsub.f32 %v1342_v56, %v1350_v18 }
 0xf8d   :  { %v1354_v21 = vmul.f32 %v1352_v60, %v1352_v60 }
 0xf8f   :  { %v1356_v57 = vsel %vm73_vm0, %v1354_v21, 0.0 }
 0xf90   :  { %1357 = vadd.xlane.f32.xlu1 %v1356_v57  ;;  %v1349_v14 = vpop.xlane.xlu0 %1348  ;;  %v3104_v57 = vld [vmem:[#allocation20_spill] sm:$0xff] }
 0xf91   :  { %v1351_v10 = vmul.f32 %v1349_v14, %v2553_v11 }
 0xf93   :  { %v2943_v58 = vsub.f32 %v1343_v9, %v1351_v10 }
 0xf95   :  { %v1355_v0 = vmul.f32 %v2943_v58, %v2943_v58 }
 0xf97   :  { %v1359_v26 = vsel %vm73_vm0, %v1355_v0, 0.0 }
 0xf98   :  { %1360 = vadd.xlane.f32.xlu0 %v1359_v26  ;;  %v3105_v26 = vld [vmem:[#allocation21_spill] sm:$0xff] }
0x1003   :  { %v1358_v61 = vpop.xlane.xlu1 %1357 }
0x1004   :  { %v1362_v49 = vmul.f32 %v1358_v61, %v2553_v11 }
0x1006   :  { %v1364_v27 = vadd.f32 1e-05, %v1362_v49 }
0x1008   :  { %2067 = vrsqrt.f32 %v1364_v27  ;;  %vm1373_vm7 = vcmp.eq.f32.partialorder %v1364_v27, inf  ;;  %v1376_v7 = vand.u32 2147483648, %v1364_v27  ;;  %vm1375_vm8 = vcmp.eq.f32.partialorder %v1364_v27, 0.0 }
0x100b   :  { %v1361_v31 = vpop.xlane.xlu0 %1360 }
0x100c   :  { %v1363_v39 = vmul.f32 %v1361_v31, %v2553_v11 }
0x100e   :  { %v2068_v8 = vpop.eup %2067  ;;  %v1365_v1 = vadd.f32 1e-05, %v1363_v39 }
0x100f   :  { %v1367_v54 = vmul.f32 %v2068_v8, %v1364_v27 }
0x1010   :  { %2069 = vrsqrt.f32 %v1365_v1  ;;  %vm1385_vm9 = vcmp.eq.f32.partialorder %v1365_v1, inf  ;;  %v1388_v50 = vand.u32 2147483648, %v1365_v1  ;;  %vm1387_vm10 = vcmp.eq.f32.partialorder %v1365_v1, 0.0 }
0x1011   :  { %v1368_v44 = vmul.f32 %v2068_v8, %v1367_v54 }
0x1013   :  { %v1369_v25 = vmul.f32 0.5, %v1368_v44  ;;  %v2110_v44 = vld [vmem:[#allocation7 + $0x160] sm:$0xff] }
0x1015   :  { %v1370_v23 = vsub.f32 1.5, %v1369_v25 }
0x1016   :  { %v2070_v20 = vpop.eup %2069 }
0x1017   :  { %v1371_v22 = vmul.f32 %v2068_v8, %v1370_v23  ;;  %v1379_v28 = vmul.f32 %v2070_v20, %v1365_v1 }
0x1019   :  { %v1372_v48 = vmul.f32 %v1371_v22, %v1364_v27  ;;  %v1380_v29 = vmul.f32 %v2070_v20, %v1379_v28 }
0x101b   :  { %v1374_v62 = vsel %vm1373_vm7, %v1364_v27, %v1372_v48  ;;  %v1381_v35 = vmul.f32 0.5, %v1380_v29 }
0x101c   :  { %v1377_v34 = vsel %vm1375_vm8, %v1376_v7, %v1374_v62 }
0x101d   :  { %v1382_v36 = vsub.f32 1.5, %v1381_v35  ;;  %2071 = vrcp.f32 %v1377_v34  ;;  %v1401_v38 = vand.u32 2147483648, %v1377_v34  ;;  %v1399_v53 = vand.u32 2147483647, %v1377_v34 }
0x101e   :  { %vm1395_vm12 = vweird.f32 %v1377_v34 }
0x101f   :  { %v1383_v30 = vmul.f32 %v2070_v20, %v1382_v36  ;;  %v1402_v4 = vor.u32 1.1754944e-38, %v1401_v38  ;;  %vm1400_vm14 = vcmp.eq.f32.partialorder %v1399_v53, 8.507059e+37 }
0x1021   :  { %v1384_v37 = vmul.f32 %v1383_v30, %v1365_v1 }
0x1023   :  { %v2072_v17 = vpop.eup %2071  ;;  %v1386_v13 = vsel %vm1385_vm9, %v1365_v1, %v1384_v37 }
0x1024   :  { %v1391_v42 = vmul.f32 %v2072_v17, %v1377_v34  ;;  %v1389_v40 = vsel %vm1387_vm10, %v1388_v50, %v1386_v13  ;;  %vm1396_vm11 = vweird.f32 %v2072_v17 }
0x1025   :  { %2073 = vrcp.f32 %v1389_v40  ;;  %vm1397_vm13 = vmor %vm1395_vm12, %vm1396_vm11  ;;  %v1416_v21 = vand.u32 2147483648, %v1389_v40  ;;  %v1414_v0 = vand.u32 2147483647, %v1389_v40  ;;  %vm1410_vm2 = vweird.f32 %v1389_v40 }
0x1026   :  { %v1392_v51 = vsub.f32 1.0, %v1391_v42 }
0x1027   :  { %v1417_v27 = vor.u32 1.1754944e-38, %v1416_v21  ;;  %vm1415_vm4 = vcmp.eq.f32.partialorder %v1414_v0, 8.507059e+37 }
0x1028   :  { %v1393_v55 = vmul.f32 %v2072_v17, %v1392_v51 }
0x102a   :  { %v1394_v56 = vadd.f32 %v2072_v17, %v1393_v55 }
0x102b   :  { %v2074_v46 = vpop.eup %2073 }
0x102c   :  { %v1398_v5 = vsel %vm1397_vm13, %v2072_v17, %v1394_v56  ;;  %v1406_v9 = vmul.f32 %v2074_v46, %v1389_v40  ;;  %vm1411_vm15 = vweird.f32 %v2074_v46 }
0x102d   :  { %v1403_v2 = vsel %vm1400_vm14, %v1402_v4, %v1398_v5  ;;  %vm1412_vm3 = vmor %vm1410_vm2, %vm1411_vm15 }
0x102e   :  { %v1404_v47 = vmul.f32 %v1403_v2, %v1352_v60  ;;  %v1407_v18 = vsub.f32 1.0, %v1406_v9 }
0x1030   :  { %v1420_v14 = vmul.f32 %v1404_v47, %v3104_v57  ;;  %v1408_v10 = vmul.f32 %v2074_v46, %v1407_v18 }
0x1032   :  { %v2952_v61 = vadd.f32 %v1420_v14, %v3105_v26  ;;  %v1409_v49 = vadd.f32 %v2074_v46, %v1408_v10 }
0x1034   :  { %1917 = vmatmul.msk.f32.vlgmr.msrb.gmra.mxu1 %vm73_vm0, %v2952_v61  ;;  %v1413_v31 = vsel %vm1412_vm3, %v2074_v46, %v1409_v49 }
0x1035   :  { %v1418_v60 = vsel %vm1415_vm4, %v1417_v27, %v1413_v31  ;;  %1939 = vmatpush.msrb.mxu1 %v2733_v43 }
0x1036   :  { %v1419_v39 = vmul.f32 %v1418_v60, %v2943_v58 }
0x1037   :  { %1940 = vmatpush.msrb.mxu1 %v2735_v6  ;;  %v3106_v6 = vld [vmem:[#allocation22_spill] sm:$0xff] }
0x1038   :  { %v1421_v8 = vmul.f32 %v1419_v39, %v3104_v57 }
0x1039   :  { %1941 = vmatpush.msrb.mxu1 %v2738_v45 }
0x103a   :  { %v2962_v1 = vadd.f32 %v1421_v8, %v3105_v26 }
0x103b   :  { %1942 = vmatpush.msrb.mxu1 %v2741_v19 }
0x103c   :  { %1918 = vmatmul.msk.f32.gmra.mxu1 %vm73_vm0, %v2962_v1 }
0x103d   :  { %1943 = vmatpush.msrb.mxu1 %v2744_v3 }
0x103f   :  { %1944 = vmatpush.msrb.mxu1 %v2747_v59 }
0x1041   :  { %1945 = vmatpush.msrb.mxu1 %v2769_v63  ;;  %v2111_v63 = vld [vmem:[#allocation7 + $0x168] sm:$0xff] }
0x1043   :  { %1946 = vmatpush.msrb.mxu1 %v2772_v24 }
0x10b1   :  { %v1447_v43 = vpop.f32.mrf.mxu1 }
0x10b2   :  { %v1448_v58 = vadd.f32 %v1447_v43, %v3106_v6 }
0x10b4   :  { %1927 = vmatmul.msk.f32.vlgmr.msra.gmra.mxu2 %vm73_vm0, %v1448_v58 }
0x10b9   :  { %v1450_v45 = vpop.f32.mrf.mxu1 }
0x10ba   :  { %v1451_v54 = vadd.f32 %v1450_v45, %v3106_v6 }
0x10bc   :  { %1928 = vmatmul.msk.f32.gmra.mxu2 %vm73_vm0, %v1451_v54 }
0x1137   :  { %v1476_v19 = vpop.f32.mrf.mxu2 }
0x1138   :  { %v1477_v25 = vadd.f32 %v2110_v44, %v1476_v19 }
0x113a   :  { %v1482_v3 = vsel %vm312_vm1, %v1477_v25, -inf }
0x113b   :  { %1483 = vmax.xlane.f32.xlu1 %v1482_v3 }
0x113f   :  { %v1479_v59 = vpop.f32.mrf.mxu2 }
0x1140   :  { %v1480_v23 = vadd.f32 %v2111_v63, %v1479_v59 }
0x1142   :  { %v1485_v24 = vsel %vm312_vm1, %v1480_v23, -inf }
0x1143   :  { %1486 = vmax.xlane.f32.xlu0 %v1485_v24 }
0x11ae   :  { %v1484_v20 = vpop.xlane.xlu1 %1483 }
0x11af   :  { %v1488_v22 = vsub.f32 %v1477_v25, %v1484_v20 }
0x11b1   :  { %v1490_v28 = vmul.f32 1.442695, %v1488_v22 }
0x11b3   :  { %2075 = vpow2.f32 %v1490_v28 }
0x11b6   :  { %v1487_v48 = vpop.xlane.xlu0 %1486 }
0x11b7   :  { %v1489_v29 = vsub.f32 %v1480_v23, %v1487_v48 }
0x11b9   :  { %v2076_v7 = vpop.eup %2075  ;;  %v1492_v62 = vmul.f32 1.442695, %v1489_v29 }
0x11ba   :  { %1929 = vmatmul.msk.f32.vlgmr.msrb.gmra.mxu3 %vm312_vm1, %v2076_v7 }
0x11bb   :  { %2077 = vpow2.f32 %v1492_v62 }
0x11c1   :  { %v2078_v35 = vpop.eup %2077 }
0x11c2   :  { %1930 = vmatmul.msk.f32.gmra.mxu3 %vm312_vm1, %v2078_v35 }
0x123d   :  { %v1517_v34 = vpop.f32.mrf.mxu3 }
0x123e   :  { %2079 = vrcp.f32 %v1517_v34  ;;  %v1534_v17 = vand.u32 2147483648, %v1517_v34  ;;  %v1532_v42 = vand.u32 2147483647, %v1517_v34  ;;  %vm1528_vm6 = vweird.f32 %v1517_v34 }
0x1240   :  { %v1535_v38 = vor.u32 1.1754944e-38, %v1534_v17  ;;  %vm1533_vm8 = vcmp.eq.f32.partialorder %v1532_v42, 8.507059e+37 }
0x1244   :  { %v2080_v36 = vpop.eup %2079 }
0x1245   :  { %v1524_v30 = vmul.f32 %v2080_v36, %v1517_v34  ;;  %v1520_v37 = vpop.f32.mrf.mxu3  ;;  %vm1529_vm5 = vweird.f32 %v2080_v36 }
0x1246   :  { %2081 = vrcp.f32 %v1520_v37  ;;  %vm1530_vm7 = vmor %vm1528_vm6, %vm1529_vm5  ;;  %v1549_v5 = vand.u32 2147483648, %v1520_v37  ;;  %v1547_v2 = vand.u32 2147483647, %v1520_v37  ;;  %vm1543_vm10 = vweird.f32 %v1520_v37 }
0x1247   :  { %v1525_v50 = vsub.f32 1.0, %v1524_v30 }
0x1248   :  { %v1550_v18 = vor.u32 1.1754944e-38, %v1549_v5  ;;  %vm1548_vm12 = vcmp.eq.f32.partialorder %v1547_v2, 8.507059e+37 }
0x1249   :  { %v1526_v13 = vmul.f32 %v2080_v36, %v1525_v50 }
0x124b   :  { %v1527_v40 = vadd.f32 %v2080_v36, %v1526_v13 }
0x124c   :  { %v2082_v51 = vpop.eup %2081 }
0x124d   :  { %v1531_v55 = vsel %vm1530_vm7, %v2080_v36, %v1527_v40  ;;  %v1539_v53 = vmul.f32 %v2082_v51, %v1520_v37  ;;  %vm1544_vm9 = vweird.f32 %v2082_v51 }
0x124e   :  { %v1536_v56 = vsel %vm1533_vm8, %v1535_v38, %v1531_v55  ;;  %vm1545_vm11 = vmor %vm1543_vm10, %vm1544_vm9 }
0x124f   :  { %v1540_v46 = vsub.f32 1.0, %v1539_v53  ;;  %v1537_v4 = vmul.f32 %v2076_v7, %v1536_v56 }
0x1251   :  { %v1541_v9 = vmul.f32 %v2082_v51, %v1540_v46  ;;  %1931 = vmatmul.msk.f32.vlgmr.msra.gmra.mxu0 %vm312_vm1, %v1537_v4 }
0x1253   :  { %v1542_v47 = vadd.f32 %v2082_v51, %v1541_v9 }
0x1255   :  { %v1546_v21 = vsel %vm1545_vm11, %v2082_v51, %v1542_v47 }
0x1256   :  { %v1551_v57 = vsel %vm1548_vm12, %v1550_v18, %v1546_v21 }
0x1257   :  { %v1552_v14 = vmul.f32 %v2078_v35, %v1551_v57 }
0x1259   :  { %1932 = vmatmul.msk.f32.gmra.mxu0 %vm312_vm1, %v1552_v14 }
0x12ce   :  { %v1576_v10 = vpop.f32.mrf.mxu0 }
0x12cf   :  { %1933 = vmatmul.msk.f32.vlgmr.msra.gmra.mxu1 %vm73_vm0, %v1576_v10 }
0x12d6   :  { %v1579_v0 = vpop.f32.mrf.mxu0 }
0x12d7   :  { %1934 = vmatmul.msk.f32.gmra.mxu1 %vm73_vm0, %v1579_v0 }
0x134c   :  { %v1605_v26 = vpop.f32.mrf.mxu1 }
0x134d   :  { %v1606_v49 = vadd.f32 %v1605_v26, %v2691_v12 }
0x134f   :  { %v1611_v27 = vadd.f32 %v1606_v49, %v2952_v61 }
0x1351   :  { %v1613_v31 = vsel %vm73_vm0, %v1611_v27, 0.0 }
0x1352   :  { %1614 = vadd.xlane.f32.xlu1 %v1613_v31 }
0x1354   :  { %v1608_v60 = vpop.f32.mrf.mxu1 }
0x1355   :  { %v1609_v39 = vadd.f32 %v1608_v60, %v2691_v12 }
0x1357   :  { %v1612_v8 = vadd.f32 %v1609_v39, %v2962_v1 }
0x1359   :  { %v1616_v43 = vsel %vm73_vm0, %v1612_v8, 0.0 }
0x135a   :  { %1617 = vadd.xlane.f32.xlu0 %v1616_v43 }
0x13c5   :  { %v1615_v6 = vpop.xlane.xlu1 %1614 }
0x13c6   :  { %v1619_v58 = vmul.f32 %v1615_v6, %v2553_v11 }
0x13c8   :  { %v1621_v45 = vsub.f32 %v1611_v27, %v1619_v58 }
0x13ca   :  { %v1623_v54 = vmul.f32 %v1621_v45, %v1621_v45 }
0x13cc   :  { %v1625_v19 = vsel %vm73_vm0, %v1623_v54, 0.0 }
0x13cd   :  { %1626 = vadd.xlane.f32.xlu1 %v1625_v19  ;;  %v1618_v61 = vpop.xlane.xlu0 %1617 }
0x13ce   :  { %v1620_v44 = vmul.f32 %v1618_v61, %v2553_v11 }
0x13d0   :  { %v2992_v25 = vsub.f32 %v1612_v8, %v1620_v44 }
0x13d2   :  { %v1624_v12 = vmul.f32 %v2992_v25, %v2992_v25 }
0x13d4   :  { %v1628_v1 = vsel %vm73_vm0, %v1624_v12, 0.0 }
0x13d5   :  { %1629 = vadd.xlane.f32.xlu0 %v1628_v1 }
0x1440   :  { %v1627_v3 = vpop.xlane.xlu1 %1626 }
0x1441   :  { %v1631_v59 = vmul.f32 %v1627_v3, %v2553_v11 }
0x1443   :  { %v1633_v63 = vadd.f32 1e-05, %v1631_v59 }
0x1445   :  { %2083 = vrsqrt.f32 %v1633_v63  ;;  %vm1642_vm13 = vcmp.eq.f32.partialorder %v1633_v63, inf  ;;  %v1645_v37 = vand.u32 2147483648, %v1633_v63  ;;  %vm1644_vm14 = vcmp.eq.f32.partialorder %v1633_v63, 0.0 }
0x1448   :  { %v1630_v23 = vpop.xlane.xlu0 %1629 }
0x1449   :  { %v1632_v24 = vmul.f32 %v1630_v23, %v2553_v11 }
0x144b   :  { %v2084_v20 = vpop.eup %2083  ;;  %v1634_v22 = vadd.f32 1e-05, %v1632_v24 }
0x144c   :  { %v1636_v28 = vmul.f32 %v2084_v20, %v1633_v63 }
0x144d   :  { %2085 = vrsqrt.f32 %v1634_v22  ;;  %vm1654_vm15 = vcmp.eq.f32.partialorder %v1634_v22, inf  ;;  %v1657_v38 = vand.u32 2147483648, %v1634_v22  ;;  %vm1656_vm2 = vcmp.eq.f32.partialorder %v1634_v22, 0.0 }
0x144e   :  { %v1637_v48 = vmul.f32 %v2084_v20, %v1636_v28 }
0x1450   :  { %v1638_v29 = vmul.f32 0.5, %v1637_v48 }
0x1452   :  { %v1639_v7 = vsub.f32 1.5, %v1638_v29 }
0x1453   :  { %v2086_v62 = vpop.eup %2085 }
0x1454   :  { %v1640_v35 = vmul.f32 %v2084_v20, %v1639_v7  ;;  %v1648_v34 = vmul.f32 %v2086_v62, %v1634_v22 }
0x1456   :  { %v1641_v36 = vmul.f32 %v1640_v35, %v1633_v63  ;;  %v1649_v30 = vmul.f32 %v2086_v62, %v1648_v34 }
0x1458   :  { %v1643_v50 = vsel %vm1642_vm13, %v1633_v63, %v1641_v36  ;;  %v1650_v17 = vmul.f32 0.5, %v1649_v30 }
0x1459   :  { %v1646_v13 = vsel %vm1644_vm14, %v1645_v37, %v1643_v50 }
0x145a   :  { %v1651_v42 = vsub.f32 1.5, %v1650_v17  ;;  %2087 = vrcp.f32 %v1646_v13  ;;  %v1670_v5 = vand.u32 2147483648, %v1646_v13  ;;  %v1668_v2 = vand.u32 2147483647, %v1646_v13 }
0x145b   :  { %vm1664_vm4 = vweird.f32 %v1646_v13 }
0x145c   :  { %v1652_v40 = vmul.f32 %v2086_v62, %v1651_v42  ;;  %v1671_v21 = vor.u32 1.1754944e-38, %v1670_v5  ;;  %vm1669_vm6 = vcmp.eq.f32.partialorder %v1668_v2, 8.507059e+37 }
0x145e   :  { %v1653_v51 = vmul.f32 %v1652_v40, %v1634_v22 }
0x1460   :  { %v2088_v55 = vpop.eup %2087  ;;  %v1655_v53 = vsel %vm1654_vm15, %v1634_v22, %v1653_v51 }
0x1461   :  { %v1660_v56 = vmul.f32 %v2088_v55, %v1646_v13  ;;  %v1658_v46 = vsel %vm1656_vm2, %v1657_v38, %v1655_v53  ;;  %vm1665_vm3 = vweird.f32 %v2088_v55 }
0x1462   :  { %2089 = vrcp.f32 %v1658_v46  ;;  %vm1666_vm5 = vmor %vm1664_vm4, %vm1665_vm3  ;;  %v1685_v49 = vand.u32 2147483648, %v1658_v46  ;;  %v1683_v60 = vand.u32 2147483647, %v1658_v46  ;;  %vm1679_vm8 = vweird.f32 %v1658_v46 }
0x1463   :  { %v1661_v4 = vsub.f32 1.0, %v1660_v56 }
0x1464   :  { %v1686_v43 = vor.u32 1.1754944e-38, %v1685_v49  ;;  %vm1684_vm10 = vcmp.eq.f32.partialorder %v1683_v60, 8.507059e+37 }
0x1465   :  { %v1662_v9 = vmul.f32 %v2088_v55, %v1661_v4 }
0x1467   :  { %v1663_v47 = vadd.f32 %v2088_v55, %v1662_v9 }
0x1468   :  { %v2090_v18 = vpop.eup %2089 }
0x1469   :  { %v1667_v57 = vsel %vm1666_vm5, %v2088_v55, %v1663_v47  ;;  %v1675_v14 = vmul.f32 %v2090_v18, %v1658_v46  ;;  %vm1680_vm7 = vweird.f32 %v2090_v18 }
0x146a   :  { %v1672_v10 = vsel %vm1669_vm6, %v1671_v21, %v1667_v57  ;;  %vm1681_vm9 = vmor %vm1679_vm8, %vm1680_vm7 }
0x146b   :  { %v1673_v0 = vmul.f32 %v1672_v10, %v1621_v45  ;;  %v1676_v26 = vsub.f32 1.0, %v1675_v14 }
0x146d   :  { %v1689_v27 = vmul.f32 %v1673_v0, %v2752_v41  ;;  %v1677_v31 = vmul.f32 %v2090_v18, %v1676_v26 }
0x146f   :  { %v1691_v39 = vadd.f32 %v1689_v27, %v2756_v52  ;;  %v1678_v8 = vadd.f32 %v2090_v18, %v1677_v31 }
0x1471   :  { %1935 = vmatmul.msk.f32.vlgmr.msra.gmra.mxu3 %vm73_vm0, %v1691_v39  ;;  %v1682_v6 = vsel %vm1681_vm9, %v2090_v18, %v1678_v8 }
0x1472   :  { %v1687_v58 = vsel %vm1684_vm10, %v1686_v43, %v1682_v6 }
0x1473   :  { %v1688_v45 = vmul.f32 %v1687_v58, %v2992_v25 }
0x1475   :  { %v1690_v54 = vmul.f32 %v1688_v45, %v2752_v41 }
0x1477   :  { %v1692_v19 = vadd.f32 %v1690_v54, %v2756_v52 }
0x1479   :  { %1936 = vmatmul.msk.f32.gmra.mxu3 %vm73_vm0, %v1692_v19 }
0x14f4   :  { %v1716_v61 = vpop.f32.mrf.mxu3 }
0x14f5   :  { %v1717_v44 = vadd.f32 %v1716_v61, %v2775_v16 }
0x14f7   :  { %v1722_v12 = vmax.f32 %v1717_v44, 0.0 }
0x14f9   :  { %1937 = vmatmul.msk.f32.vlgmr.msrb.gmra.mxu0 %vm312_vm1, %v1722_v12 }
0x14fc   :  { %v1719_v1 = vpop.f32.mrf.mxu3 }
0x14fd   :  { %v1720_v3 = vadd.f32 %v1719_v1, %v2775_v16 }
0x14ff   :  { %v1723_v59 = vmax.f32 %v1720_v3, 0.0 }
0x1501   :  { %1938 = vmatmul.msk.f32.vlgmr.msrb.gmra.mxu1 %vm312_vm1, %v1723_v59 }
0x1576   :  { %v1747_v63 = vpop.f32.mrf.mxu0 }
0x1577   :  { %v1748_v25 = vadd.f32 %v1747_v63, %v2781_v33 }
0x1579   :  { %v1753_v41 = vadd.f32 %v1748_v25, %v1691_v39 }
0x157b   :  { %v1755_v52 = vsel %vm73_vm0, %v1753_v41, 0.0 }
0x157c   :  { %1756 = vadd.xlane.f32.xlu1 %v1755_v52 }
0x157e   :  { %v1750_v23 = vpop.f32.mrf.mxu1 }
0x157f   :  { %v1751_v24 = vadd.f32 %v1750_v23, %v2781_v33 }
0x1581   :  { %v1754_v20 = vadd.f32 %v1751_v24, %v1692_v19 }
0x1583   :  { %v1758_v22 = vsel %vm73_vm0, %v1754_v20, 0.0 }
0x1584   :  { %1759 = vadd.xlane.f32.xlu2 %v1758_v22 }
0x15ef   :  { %v1757_v28 = vpop.xlane.xlu1 %1756 }
0x15f0   :  { %v1761_v16 = vmul.f32 %v1757_v28, %v2553_v11 }
0x15f2   :  { %v1763_v48 = vsub.f32 %v1753_v41, %v1761_v16 }
0x15f4   :  { %v1765_v29 = vmul.f32 %v1763_v48, %v1763_v48 }
0x15f6   :  { %v1767_v7 = vsel %vm73_vm0, %v1765_v29, 0.0 }
0x15f7   :  { %1768 = vadd.xlane.f32.xlu0 %v1767_v7  ;;  %v1760_v62 = vpop.xlane.xlu2 %1759 }
0x15f8   :  { %v1762_v35 = vmul.f32 %v1760_v62, %v2553_v11 }
0x15fa   :  { %v3017_v34 = vsub.f32 %v1754_v20, %v1762_v35 }
0x15fc   :  { %v1766_v33 = vmul.f32 %v3017_v34, %v3017_v34 }
0x15fe   :  { %v1770_v36 = vsel %vm73_vm0, %v1766_v33, 0.0 }
0x15ff   :  { %1771 = vadd.xlane.f32.xlu1 %v1770_v36 }
0x166a   :  { %v1769_v30 = vpop.xlane.xlu0 %1768 }
0x166b   :  { %v1773_v37 = vmul.f32 %v1769_v30, %v2553_v11 }
0x166d   :  { %v1775_v50 = vadd.f32 1e-05, %v1773_v37 }
0x166f   :  { %2091 = vrsqrt.f32 %v1775_v50  ;;  %vm1784_vm1 = vcmp.eq.f32.partialorder %v1775_v50, inf  ;;  %v1787_v2 = vand.u32 2147483648, %v1775_v50  ;;  %vm1786_vm11 = vcmp.eq.f32.partialorder %v1775_v50, 0.0 }
0x1672   :  { %v1772_v17 = vpop.xlane.xlu1 %1771 }
0x1673   :  { %v1774_v13 = vmul.f32 %v1772_v17, %v2553_v11 }
0x1675   :  { %v2092_v42 = vpop.eup %2091  ;;  %v1776_v40 = vadd.f32 1e-05, %v1774_v13 }
0x1676   :  { %v1778_v51 = vmul.f32 %v2092_v42, %v1775_v50 }
0x1677   :  { %2093 = vrsqrt.f32 %v1776_v40  ;;  %vm1796_vm12 = vcmp.eq.f32.partialorder %v1776_v40, inf  ;;  %v1799_v10 = vand.u32 2147483648, %v1776_v40  ;;  %vm1798_vm13 = vcmp.eq.f32.partialorder %v1776_v40, 0.0 }
0x1678   :  { %v1779_v38 = vmul.f32 %v2092_v42, %v1778_v51 }
0x167a   :  { %v1780_v55 = vmul.f32 0.5, %v1779_v38 }
0x167c   :  { %v1781_v53 = vsub.f32 1.5, %v1780_v55 }
0x167d   :  { %v2094_v56 = vpop.eup %2093 }
0x167e   :  { %v1782_v46 = vmul.f32 %v2092_v42, %v1781_v53  ;;  %v1790_v4 = vmul.f32 %v2094_v56, %v1776_v40 }
0x1680   :  { %v1783_v5 = vmul.f32 %v1782_v46, %v1775_v50  ;;  %v1791_v9 = vmul.f32 %v2094_v56, %v1790_v4 }
0x1682   :  { %v1785_v47 = vsel %vm1784_vm1, %v1775_v50, %v1783_v5  ;;  %v1792_v18 = vmul.f32 0.5, %v1791_v9 }
0x1683   :  { %v1788_v21 = vsel %vm1786_vm11, %v1787_v2, %v1785_v47 }
0x1684   :  { %v1793_v57 = vsub.f32 1.5, %v1792_v18  ;;  %2095 = vrcp.f32 %v1788_v21  ;;  %v1812_v60 = vand.u32 2147483648, %v1788_v21  ;;  %v1810_v8 = vand.u32 2147483647, %v1788_v21 }
0x1685   :  { %vm1806_vm15 = vweird.f32 %v1788_v21 }
0x1686   :  { %v1794_v11 = vmul.f32 %v2094_v56, %v1793_v57  ;;  %v1813_v58 = vor.u32 1.1754944e-38, %v1812_v60  ;;  %vm1811_vm3 = vcmp.eq.f32.partialorder %v1810_v8, 8.507059e+37 }
0x1688   :  { %v1795_v14 = vmul.f32 %v1794_v11, %v1776_v40 }
0x168a   :  { %v2096_v0 = vpop.eup %2095  ;;  %v1797_v26 = vsel %vm1796_vm12, %v1776_v40, %v1795_v14 }
0x168b   :  { %v1800_v49 = vsel %vm1798_vm13, %v1799_v10, %v1797_v26  ;;  %v1802_v27 = vmul.f32 %v2096_v0, %v1788_v21  ;;  %vm1807_vm14 = vweird.f32 %v2096_v0 }
0x168c   :  { %2097 = vrcp.f32 %v1800_v49  ;;  %vm1808_vm2 = vmor %vm1806_vm15, %vm1807_vm14  ;;  %v1827_v12 = vand.u32 2147483648, %v1800_v49  ;;  %v1825_v3 = vand.u32 2147483647, %v1800_v49  ;;  %vm1821_vm5 = vweird.f32 %v1800_v49 }
0x168d   :  { %v1803_v31 = vsub.f32 1.0, %v1802_v27 }
0x168e   :  { %v1828_v41 = vor.u32 1.1754944e-38, %v1827_v12  ;;  %vm1826_vm7 = vcmp.eq.f32.partialorder %v1825_v3, 8.507059e+37 }
0x168f   :  { %v1804_v39 = vmul.f32 %v2096_v0, %v1803_v31 }
0x1691   :  { %v1805_v43 = vadd.f32 %v2096_v0, %v1804_v39 }
0x1692   :  { %v2098_v6 = vpop.eup %2097 }
0x1693   :  { %v1809_v45 = vsel %vm1808_vm2, %v2096_v0, %v1805_v43  ;;  %v1817_v54 = vmul.f32 %v2098_v6, %v1800_v49  ;;  %vm1822_vm4 = vweird.f32 %v2098_v6 }
0x1694   :  { %v1814_v19 = vsel %vm1811_vm3, %v1813_v58, %v1809_v45  ;;  %vm1823_vm6 = vmor %vm1821_vm5, %vm1822_vm4 }
0x1695   :  { %v1815_v61 = vmul.f32 %v1814_v19, %v1763_v48  ;;  %v1818_v44 = vsub.f32 1.0, %v1817_v54 }
0x1697   :  { %v1819_v1 = vmul.f32 %v2098_v6, %v1818_v44  ;;  %v1831_v59 = vmul.f32 %v1815_v61, %v2798_v32 }
0x1699   :  { %v1820_v63 = vadd.f32 %v2098_v6, %v1819_v1  ;;  %v1833_v25 = vadd.f32 %v1831_v59, %v2801_v15 }
0x169b   :  { %v1824_v52 = vsel %vm1823_vm6, %v2098_v6, %v1820_v63  ;;  %1835 = vst.msk [vmem:[#allocation8] sm:$0xff] %vm73_vm0, %v1833_v25 }
0x169c   :  { %v1829_v23 = vsel %vm1826_vm7, %v1828_v41, %v1824_v52 }
0x169d   :  { %v1830_v24 = vmul.f32 %v1829_v23, %v3017_v34 }
0x169f   :  { %v1832_v20 = vmul.f32 %v1830_v24, %v2798_v32 }
0x16a1   :  { %v1834_v22 = vadd.f32 %v1832_v20, %v2801_v15 }
0x16a3   :  { %1836 = vst.msk [vmem:[#allocation8 + $0x8] sm:$0xff] %vm73_vm0, %v1834_v22 }
0x16a4   :  { %1849 = dma.vmem_to_hbm [thread:$0]  %s1842_s30, 256, %s1844_s6, [#allocation4], %s2215_s20, %s2215_s20, %s2216_s21  }
0x16a5   :  { %2212 = dma.done.wait [#allocation4], 256  }
0x16a6   :  { %2213 = vsyncadd [#allocation4], 4294967040 }
0x16a7   :  { %1854 = vsyncpa [#allocation3], 1 }
0x16a8   :  { %1855 = vsyncpa [#allocation6], 1 }
0x16a9   :  { %1856 = vsyncpa [#allocation4], 1 }

</bundles_post_ra>
